<compile_context>
chip_gen: v7x
topology: tpu7x:2x2x1
jax: 0.10.0
libtpu: 0.0.40
codegen_flags: <defaults>
</compile_context>

<pallas_src>
import functools

import jax
import jax.numpy as jnp
from jax.experimental import pallas as pl
from jax.experimental.pallas import tpu as pltpu

KERNEL_SIZES = (3, 5, 7)
PAD_MAX = max(KERNEL_SIZES) // 2          # = 3
NUM_TAPS = 2 * PAD_MAX + 1                # = 7
LN_EPS = 1e-5

LANE = 128                                # lane width (last-dim pack)
HALO_BLOCK = 16                           # bf16 sublane pack; halo DMA block rows
HALO_ALIGN = 16                           # center-copy offset inside the scratch


def _round_up(x, m):
    return (x + m - 1) // m * m


# --------------------------------------------------------------------------- #
# Kernel
# --------------------------------------------------------------------------- #
def _mstc_kernel(xprev_ref, xcur_ref, xnext_ref, wf_ref, bf_ref,
                 gamma_ref, beta_ref, o_ref, xbuf, *, t_tile, h_true):
    """One (batch, time-tile) step: fused multi-scale conv + projection + LN."""
    t = pl.program_id(1)
    nt = pl.num_programs(1)
    hp = o_ref.shape[-1]

    # ---- assemble the haloed window in VMEM scratch -------------------------
    # Center copy lands at row 16 => pack-aligned, unmasked store of the big tile.
    xbuf[HALO_ALIGN:HALO_ALIGN + t_tile, :] = xcur_ref[0]

    # Previous-tile halo: last 3 rows of the (1,16,Hp) prev-halo block.
    @pl.when(t > 0)
    def _():
        xbuf[HALO_ALIGN - PAD_MAX:HALO_ALIGN, :] = \
            xprev_ref[0][HALO_BLOCK - PAD_MAX:, :]

    @pl.when(t == 0)
    def _():
        xbuf[HALO_ALIGN - PAD_MAX:HALO_ALIGN, :] = \
            jnp.zeros((PAD_MAX, hp), xbuf.dtype)

    # Next-tile halo: first 3 rows of the (1,16,Hp) next-halo block.
    @pl.when(t < nt - 1)
    def _():
        xbuf[HALO_ALIGN + t_tile:HALO_ALIGN + t_tile + PAD_MAX, :] = \
            xnext_ref[0][:PAD_MAX, :]

    @pl.when(t == nt - 1)
    def _():
        xbuf[HALO_ALIGN + t_tile:HALO_ALIGN + t_tile + PAD_MAX, :] = \
            jnp.zeros((PAD_MAX, hp), xbuf.dtype)

    # ---- fused conv branches + projection: 7 full-width bf16 MXU matmuls ----
    # Accumulator is initialised with the fused bias (conv biases @ Wp + bp).
    acc = bf_ref[...].astype(jnp.float32)                  # (1, Hp), broadcasts
    # TODO(synk): if the bundle dump shows significant sublane-repack traffic from
    # these 7 unaligned LHS slices, switch to an aligned (t_tile, 7*Hp) im2col
    # scratch and a single (t_tile,7Hp)x(7Hp,Hp) dot (K-reduction on the MXU).
    for s in range(NUM_TAPS):                              # statically unrolled
        lhs = xbuf[HALO_ALIGN - PAD_MAX + s:HALO_ALIGN - PAD_MAX + s + t_tile, :]
        acc = acc + jnp.dot(lhs, wf_ref[s], preferred_element_type=jnp.float32)

    # ---- LayerNorm over the true H (masked if H was lane-padded) ------------
    inv_h = 1.0 / float(h_true)
    mean = jnp.sum(acc, axis=-1, keepdims=True) * inv_h    # padded lanes are 0
    cen = acc - mean
    if hp != h_true:
        lane_idx = jax.lax.broadcasted_iota(jnp.int32, acc.shape, 1)
        cen = jnp.where(lane_idx < h_true, cen, 0.0)
    var = jnp.sum(cen * cen, axis=-1, keepdims=True) * inv_h
    normed = cen * jax.lax.rsqrt(var + LN_EPS)
    out = normed * gamma_ref[...] + beta_ref[...]          # padded gamma/beta = 0
    o_ref[0] = out.astype(o_ref.dtype)


# --------------------------------------------------------------------------- #
# Host-side weight fusion
# --------------------------------------------------------------------------- #
def _fuse_params(params, hidden_size):
    """Fold conv weights/biases and the projection into 7 (H,H) taps + one bias."""
    C = hidden_size // len(KERNEL_SIZES)
    wp = params["wp"]                                      # (3C, H) f32
    w_fused = jnp.zeros((NUM_TAPS, hidden_size, hidden_size), jnp.float32)
    b_fused = params["bp"][0]                              # (H,)
    for idx, k in enumerate(KERNEL_SIZES):
        w = params[f"w{k}"]                                # (k, H, C)
        b = params[f"b{k}"][0]                             # (C,)
        wp_k = wp[idx * C:(idx + 1) * C]                   # (C, H)
        off = PAD_MAX - k // 2
        for j in range(k):
            w_fused = w_fused.at[off + j].add(w[j] @ wp_k)
        b_fused = b_fused + b @ wp_k
    return w_fused, b_fused


# --------------------------------------------------------------------------- #
# VMEM budgeting / tile selection
# --------------------------------------------------------------------------- #
def _vmem_capacity_bytes():
    try:
        return int(pltpu.get_tpu_info().vmem_capacity_bytes)
    except Exception:
        return 64 * 1024 * 1024        # conservative (v7x per-TC VMEM)


def _vmem_bytes_estimate(t_tile, hp, out_itemsize):
    weights = NUM_TAPS * hp * hp * 2 * 2                   # bf16, 2 bufs
    vecs = 3 * hp * 4 * 2                                  # bias/gamma/beta f32
    act_in = (t_tile * hp * 2 + 2 * HALO_BLOCK * hp * 2) * 2   # bf16, 2 bufs each
    out = t_tile * hp * out_itemsize * 2                   # 2 bufs
    scratch = (t_tile + 2 * HALO_ALIGN) * hp * 2           # xbuf (bf16)
    return weights + vecs + act_in + out + scratch


def _pick_t_tile(T, hp, capacity, out_itemsize):
    """Largest multiple-of-16 time tile (<= per-generation target) fitting VMEM."""
    # Larger tiles amortise the ~0.35us per-grid-step overhead and the LN epilogue:
    # target 512 rows on 128 MiB parts (v5e/v6e), 256 on v7x's 64 MiB.
    target = 512 if capacity >= (100 << 20) else 256
    cap = min(target, _round_up(T, HALO_BLOCK))
    budget = capacity // 2                                 # leave pipeline headroom
    for cand in range(cap, HALO_BLOCK - 1, -HALO_BLOCK):
        if _vmem_bytes_estimate(cand, hp, out_itemsize) <= budget:
            return cand
    # TODO(synk): for very large H (>= ~2048) the resident 7*Hp*Hp bf16 weights no
    # longer fit v7x's 64 MiB VMEM even at t_tile=16 — stream taps over an extra
    # "arbitrary" grid axis or tile the output-H dimension instead.
    return HALO_BLOCK


# --------------------------------------------------------------------------- #
# Wrapper
# --------------------------------------------------------------------------- #
def multi_scale_temporal_conv(x, params, *, t_tile=None, out_dtype=jnp.float32):
    """x: (B, T, H) float32.  params: dict of weights (see init_params)."""
    B, T, H = x.shape
    Hp = _round_up(H, LANE)                                # lane-dense hidden dim
    out_itemsize = jnp.dtype(out_dtype).itemsize
    capacity = _vmem_capacity_bytes()

    # ---- host-side weight fusion (runs once, pure JAX), pad + cast ----------
    w_fused, b_fused = _fuse_params(params, H)
    gamma, beta = params["gamma"], params["beta"]
    if Hp != H:
        w_fused = jnp.pad(w_fused, ((0, 0), (0, Hp - H), (0, Hp - H)))
        b_fused = jnp.pad(b_fused, (0, Hp - H))
        gamma = jnp.pad(gamma, ((0, 0), (0, Hp - H)))
        beta = jnp.pad(beta, ((0, 0), (0, Hp - H)))
    w_fused = w_fused.astype(jnp.bfloat16)                 # MXU operands in bf16
    b_fused = b_fused.reshape(1, Hp)                       # f32, added to f32 acc

    # ---- tiling (time padded to a multiple of t_tile; conv zero-pads anyway) -
    if t_tile is None:
        t_tile = _pick_t_tile(T, Hp, capacity, out_itemsize)
    assert t_tile % HALO_BLOCK == 0 and t_tile >= HALO_BLOCK
    Tp = _round_up(max(T, t_tile), t_tile)
    nt = Tp // t_tile

    x_bf = x.astype(jnp.bfloat16)
    if Tp != T or Hp != H:
        x_bf = jnp.pad(x_bf, ((0, 0), (0, Tp - T), (0, Hp - H)))

    r = t_tile // HALO_BLOCK
    last_halo_blk = Tp // HALO_BLOCK - 1

    # Narrow halo blocks: x is passed twice more, but each extra input only DMAs a
    # 16-row slab adjacent to the current tile (clamped + zero-filled at the ends).
    def prev_halo_map(b, t):
        return (b, jnp.maximum(t * r - 1, 0), 0)

    def center_map(b, t):
        return (b, t, 0)

    def next_halo_map(b, t):
        return (b, jnp.minimum((t + 1) * r, last_halo_blk), 0)

    def const_map(b, t):
        return (0, 0)

    in_specs = [
        pl.BlockSpec((1, HALO_BLOCK, Hp), prev_halo_map),
        pl.BlockSpec((1, t_tile, Hp), center_map),
        pl.BlockSpec((1, HALO_BLOCK, Hp), next_halo_map),
        pl.BlockSpec((NUM_TAPS, Hp, Hp), lambda b, t: (0, 0, 0)),  # resident weights
        pl.BlockSpec((1, Hp), const_map),                          # fused bias (f32)
        pl.BlockSpec((1, Hp), const_map),                          # gamma
        pl.BlockSpec((1, Hp), const_map),                          # beta
    ]
    out_specs = pl.BlockSpec((1, t_tile, Hp), lambda b, t: (b, t, 0))

    kernel = functools.partial(_mstc_kernel, t_tile=t_tile, h_true=H)

    vmem_est = _vmem_bytes_estimate(t_tile, Hp, out_itemsize)
    vmem_limit = int(min(capacity - (4 << 20),
                         max(32 << 20, vmem_est + (8 << 20))))

    cost = pl.CostEstimate(
        flops=2 * B * Tp * Hp * Hp * NUM_TAPS,
        transcendentals=B * Tp,
        bytes_accessed=(B * Tp * Hp * 2                      # center activations
                        + B * nt * 2 * HALO_BLOCK * Hp * 2   # narrow halo reads
                        + NUM_TAPS * Hp * Hp * 2 + 4 * Hp * 4
                        + B * Tp * Hp * out_itemsize),
    )

    out = pl.pallas_call(
        kernel,
        out_shape=jax.ShapeDtypeStruct((B, Tp, Hp), out_dtype),
        grid_spec=pltpu.PrefetchScalarGridSpec(
            num_scalar_prefetch=0,
            grid=(B, nt),
            in_specs=in_specs,
            out_specs=out_specs,
            scratch_shapes=[pltpu.VMEM((t_tile + 2 * HALO_ALIGN, Hp), jnp.bfloat16)],
        ),
        compiler_params=pltpu.CompilerParams(
            dimension_semantics=("parallel", "parallel"),
            vmem_limit_bytes=vmem_limit,
        ),
        cost_estimate=cost,
    )(x_bf, x_bf, x_bf, w_fused, b_fused, gamma, beta)

    if Tp != T or Hp != H:
        out = out[:, :T, :H]
    return out


# --------------------------------------------------------------------------- #
# Parameters / reference
# --------------------------------------------------------------------------- #
def init_params(key, hidden_size):
    """Deterministic synthetic parameters matching the PyTorch module's shapes."""
    C = hidden_size // len(KERNEL_SIZES)
    ks = jax.random.split(key, 8)
    params = {}
    # Conv1d weights are (out_ch, in_ch, k) in PyTorch; store as (k, in_ch, out_ch)
    for i, k in enumerate(KERNEL_SIZES):
        w = jax.random.normal(ks[i], (C, hidden_size, k), jnp.float32) * 0.05
        b = jax.random.normal(ks[i + 3], (1, C), jnp.float32) * 0.05
        params[f"w{k}"] = jnp.transpose(w, (2, 1, 0))      # (k, H, C)
        params[f"b{k}"] = b
    # Linear(3*C -> H): PyTorch weight is (H, 3*C); store transposed (3*C, H)
    wp = jax.random.normal(ks[6], (hidden_size, 3 * C), jnp.float32) * 0.05
    bp = jax.random.normal(ks[7], (1, hidden_size), jnp.float32) * 0.05
    params["wp"] = jnp.transpose(wp)
    params["bp"] = bp
    params["gamma"] = jnp.ones((1, hidden_size), jnp.float32)
    params["beta"] = jnp.zeros((1, hidden_size), jnp.float32)
    return params


def _reference(x, params):
    """Pure-JAX f32 reference mirroring the PyTorch forward (unfused)."""
    B, T, H = x.shape
    outs = []
    xp = jnp.pad(x, ((0, 0), (PAD_MAX, PAD_MAX), (0, 0)))
    for k in KERNEL_SIZES:
        p = k // 2
        off = PAD_MAX - p
        w = params[f"w{k}"]                                # (k, H, C)
        y = sum(jnp.einsum("btd,dc->btc", xp[:, off + j: off + j + T, :], w[j])
                for j in range(k)) + params[f"b{k}"][0]
        outs.append(y)
    cat = jnp.concatenate(outs, axis=-1)
    proj = cat @ params["wp"] + params["bp"][0]
    mean = jnp.mean(proj, axis=-1, keepdims=True)
    var = jnp.mean((proj - mean) ** 2, axis=-1, keepdims=True)
    normed = (proj - mean) * jax.lax.rsqrt(var + LN_EPS)
    return normed * params["gamma"][0] + params["beta"][0]


if __name__ == "__main__":
    # H=96 (divisible by 3 -> out_channels=32) exercises the lane-padding (Hp=128)
    # + masked-LayerNorm path; t_tile=16 exercises the time tiling / halo path
    # (grid = (2, 2), so both parallel axes have >1 program).
    B, T, H = 2, 32, 96
    key = jax.random.PRNGKey(0)
    kx, kp = jax.random.split(key)
    x = jax.random.normal(kx, (B, T, H), jnp.float32)
    params = init_params(kp, H)

    out = multi_scale_temporal_conv(x, params, t_tile=16)
    out = jax.block_until_ready(out)

    ref = _reference(x, params)
    assert out.shape == (B, T, H)
    # bf16 matmul operands + fused accumulation order => relaxed tolerance vs the
    # two-stage f32 PyTorch path (documented, per review).
    assert jnp.allclose(out, ref, atol=5e-2, rtol=5e-2), "mismatch vs reference"
    print("KERNEL_OK")
</pallas_src>

<mosaic_0001>
module attributes {stable_mosaic.version = 11 : i64} {
  func.func @_mstc_kernel(%arg0: i32, %arg1: i32, %arg2: memref<1x16x128xbf16, #tpu.memory_space<vmem>>, %arg3: memref<1x16x128xbf16, #tpu.memory_space<vmem>>, %arg4: memref<1x16x128xbf16, #tpu.memory_space<vmem>>, %arg5: memref<7x128x128xbf16, #tpu.memory_space<vmem>>, %arg6: memref<1x128xf32, #tpu.memory_space<vmem>>, %arg7: memref<1x128xf32, #tpu.memory_space<vmem>>, %arg8: memref<1x128xf32, #tpu.memory_space<vmem>>, %arg9: memref<1x16x128xf32, #tpu.memory_space<vmem>>, %arg10: memref<48x128xbf16, #tpu.memory_space<vmem>>) attributes {dimension_semantics = [#tpu.dimension_semantics<parallel>, #tpu.dimension_semantics<parallel>], iteration_bounds = array<i64: 2, 2>, scalar_prefetch = 0 : i64, scratch_operands = 1 : i64, tpu.core_type = #tpu.core_type<tc>, window_params = [{transform_indices = @transform_0, window_bounds = array<i64: 1, 16, 128>}, {transform_indices = @transform_1, window_bounds = array<i64: 1, 16, 128>}, {transform_indices = @transform_2, window_bounds = array<i64: 1, 16, 128>}, {pipeline_mode = #tpu.pipeline_mode<synchronous>, transform_indices = @transform_3, window_bounds = array<i64: 7, 128, 128>}, {pipeline_mode = #tpu.pipeline_mode<synchronous>, transform_indices = @transform_4, window_bounds = array<i64: 1, 128>}, {pipeline_mode = #tpu.pipeline_mode<synchronous>, transform_indices = @transform_5, window_bounds = array<i64: 1, 128>}, {pipeline_mode = #tpu.pipeline_mode<synchronous>, transform_indices = @transform_6, window_bounds = array<i64: 1, 128>}, {transform_indices = @transform_7, window_bounds = array<i64: 1, 16, 128>}]} {
    %c0 = arith.constant 0 : index
    %c0_0 = arith.constant 0 : index
    %c0_1 = arith.constant 0 : index
    %0 = vector.load %arg3[%c0, %c0_0, %c0_1] : memref<1x16x128xbf16, #tpu.memory_space<vmem>>, vector<1x16x128xbf16>
    %1 = vector.shape_cast %0 : vector<1x16x128xbf16> to vector<16x128xbf16>
    %c16 = arith.constant 16 : index
    %c0_2 = arith.constant 0 : index
    %2 = vector.load %arg10[%c16, %c0_2] : memref<48x128xbf16, #tpu.memory_space<vmem>>, vector<16x128xbf16>
    tpu.vector_store %arg10[%c16, %c0_2], %1 {strides = array<i32>} : memref<48x128xbf16, #tpu.memory_space<vmem>>, vector<16x128xbf16>,
    %c0_i32 = arith.constant 0 : i32
    %3 = arith.cmpi sgt, %arg1, %c0_i32 : i32
    %4 = arith.extui %3 : i1 to i32
    %c0_i32_3 = arith.constant 0 : i32
    %5 = arith.cmpi ne, %4, %c0_i32_3 : i32
    scf.if %5 {
      %c0_53 = arith.constant 0 : index
      %c0_54 = arith.constant 0 : index
      %c0_55 = arith.constant 0 : index
      %82 = vector.load %arg2[%c0_53, %c0_54, %c0_55] : memref<1x16x128xbf16, #tpu.memory_space<vmem>>, vector<1x16x128xbf16>
      %83 = vector.shape_cast %82 : vector<1x16x128xbf16> to vector<16x128xbf16>
      %84 = vector.extract_strided_slice %83 {offsets = [13, 0], sizes = [3, 128], strides = [1, 1]} : vector<16x128xbf16> to vector<3x128xbf16>
      %c13_56 = arith.constant 13 : index
      %c0_57 = arith.constant 0 : index
      %85 = vector.load %arg10[%c13_56, %c0_57] : memref<48x128xbf16, #tpu.memory_space<vmem>>, vector<3x128xbf16>
      tpu.vector_store %arg10[%c13_56, %c0_57], %84 {strides = array<i32>} : memref<48x128xbf16, #tpu.memory_space<vmem>>, vector<3x128xbf16>,
    } else {
    }
    %c0_i32_4 = arith.constant 0 : i32
    %6 = arith.cmpi eq, %arg1, %c0_i32_4 : i32
    %7 = arith.extui %6 : i1 to i32
    %c0_i32_5 = arith.constant 0 : i32
    %8 = arith.cmpi ne, %7, %c0_i32_5 : i32
    scf.if %8 {
      %cst_53 = arith.constant 0.000000e+00 : bf16
      %82 = vector.broadcast %cst_53 : bf16 to vector<3x128xbf16>
      %c13_54 = arith.constant 13 : index
      %c0_55 = arith.constant 0 : index
      %83 = vector.load %arg10[%c13_54, %c0_55] : memref<48x128xbf16, #tpu.memory_space<vmem>>, vector<3x128xbf16>
      tpu.vector_store %arg10[%c13_54, %c0_55], %82 {strides = array<i32>} : memref<48x128xbf16, #tpu.memory_space<vmem>>, vector<3x128xbf16>,
    } else {
    }
    %c1_i32 = arith.constant 1 : i32
    %9 = arith.cmpi slt, %arg1, %c1_i32 : i32
    %10 = arith.extui %9 : i1 to i32
    %c0_i32_6 = arith.constant 0 : i32
    %11 = arith.cmpi ne, %10, %c0_i32_6 : i32
    scf.if %11 {
      %c0_53 = arith.constant 0 : index
      %c0_54 = arith.constant 0 : index
      %c0_55 = arith.constant 0 : index
      %82 = vector.load %arg4[%c0_53, %c0_54, %c0_55] : memref<1x16x128xbf16, #tpu.memory_space<vmem>>, vector<1x16x128xbf16>
      %83 = vector.shape_cast %82 : vector<1x16x128xbf16> to vector<16x128xbf16>
      %84 = vector.extract_strided_slice %83 {offsets = [0, 0], sizes = [3, 128], strides = [1, 1]} : vector<16x128xbf16> to vector<3x128xbf16>
      %c32 = arith.constant 32 : index
      %c0_56 = arith.constant 0 : index
      %85 = vector.load %arg10[%c32, %c0_56] : memref<48x128xbf16, #tpu.memory_space<vmem>>, vector<3x128xbf16>
      tpu.vector_store %arg10[%c32, %c0_56], %84 {strides = array<i32>} : memref<48x128xbf16, #tpu.memory_space<vmem>>, vector<3x128xbf16>,
    } else {
    }
    %c1_i32_7 = arith.constant 1 : i32
    %12 = arith.cmpi eq, %arg1, %c1_i32_7 : i32
    %13 = arith.extui %12 : i1 to i32
    %c0_i32_8 = arith.constant 0 : i32
    %14 = arith.cmpi ne, %13, %c0_i32_8 : i32
    scf.if %14 {
      %cst_53 = arith.constant 0.000000e+00 : bf16
      %82 = vector.broadcast %cst_53 : bf16 to vector<3x128xbf16>
      %c32 = arith.constant 32 : index
      %c0_54 = arith.constant 0 : index
      %83 = vector.load %arg10[%c32, %c0_54] : memref<48x128xbf16, #tpu.memory_space<vmem>>, vector<3x128xbf16>
      tpu.vector_store %arg10[%c32, %c0_54], %82 {strides = array<i32>} : memref<48x128xbf16, #tpu.memory_space<vmem>>, vector<3x128xbf16>,
    } else {
    }
    %c0_9 = arith.constant 0 : index
    %c0_10 = arith.constant 0 : index
    %15 = vector.load %arg6[%c0_9, %c0_10] : memref<1x128xf32, #tpu.memory_space<vmem>>, vector<1x128xf32>
    %c13 = arith.constant 13 : index
    %c0_11 = arith.constant 0 : index
    %16 = vector.load %arg10[%c13, %c0_11] : memref<48x128xbf16, #tpu.memory_space<vmem>>, vector<16x128xbf16>
    %c0_12 = arith.constant 0 : index
    %c0_13 = arith.constant 0 : index
    %c0_14 = arith.constant 0 : index
    %17 = vector.load %arg5[%c0_12, %c0_13, %c0_14] : memref<7x128x128xbf16, #tpu.memory_space<vmem>>, vector<1x128x128xbf16>
    %18 = vector.shape_cast %17 : vector<1x128x128xbf16> to vector<128x128xbf16>
    %cst = arith.constant dense<0.000000e+00> : vector<16x128xf32>
    %19 = tpu.matmul %16, %18, %cst {dimension_numbers = #tpu.dot_dimension_numbers<[1], [0], [0], [1], [0, 0, 1, 1], [], []>} : vector<16x128xbf16>, vector<128x128xbf16>, vector<16x128xf32> -> vector<16x128xf32>
    %20 = vector.broadcast %15 : vector<1x128xf32> to vector<16x128xf32>
    %21 = arith.addf %20, %19 : vector<16x128xf32>
    %c14 = arith.constant 14 : index
    %c0_15 = arith.constant 0 : index
    %22 = vector.load %arg10[%c14, %c0_15] : memref<48x128xbf16, #tpu.memory_space<vmem>>, vector<16x128xbf16>
    %c1 = arith.constant 1 : index
    %c0_16 = arith.constant 0 : index
    %c0_17 = arith.constant 0 : index
    %23 = vector.load %arg5[%c1, %c0_16, %c0_17] : memref<7x128x128xbf16, #tpu.memory_space<vmem>>, vector<1x128x128xbf16>
    %24 = vector.shape_cast %23 : vector<1x128x128xbf16> to vector<128x128xbf16>
    %cst_18 = arith.constant dense<0.000000e+00> : vector<16x128xf32>
    %25 = tpu.matmul %22, %24, %cst_18 {dimension_numbers = #tpu.dot_dimension_numbers<[1], [0], [0], [1], [0, 0, 1, 1], [], []>} : vector<16x128xbf16>, vector<128x128xbf16>, vector<16x128xf32> -> vector<16x128xf32>
    %26 = arith.addf %21, %25 : vector<16x128xf32>
    %c15 = arith.constant 15 : index
    %c0_19 = arith.constant 0 : index
    %27 = vector.load %arg10[%c15, %c0_19] : memref<48x128xbf16, #tpu.memory_space<vmem>>, vector<16x128xbf16>
    %c2 = arith.constant 2 : index
    %c0_20 = arith.constant 0 : index
    %c0_21 = arith.constant 0 : index
    %28 = vector.load %arg5[%c2, %c0_20, %c0_21] : memref<7x128x128xbf16, #tpu.memory_space<vmem>>, vector<1x128x128xbf16>
    %29 = vector.shape_cast %28 : vector<1x128x128xbf16> to vector<128x128xbf16>
    %cst_22 = arith.constant dense<0.000000e+00> : vector<16x128xf32>
    %30 = tpu.matmul %27, %29, %cst_22 {dimension_numbers = #tpu.dot_dimension_numbers<[1], [0], [0], [1], [0, 0, 1, 1], [], []>} : vector<16x128xbf16>, vector<128x128xbf16>, vector<16x128xf32> -> vector<16x128xf32>
    %31 = arith.addf %26, %30 : vector<16x128xf32>
    %c16_23 = arith.constant 16 : index
    %c0_24 = arith.constant 0 : index
    %32 = vector.load %arg10[%c16_23, %c0_24] : memref<48x128xbf16, #tpu.memory_space<vmem>>, vector<16x128xbf16>
    %c3 = arith.constant 3 : index
    %c0_25 = arith.constant 0 : index
    %c0_26 = arith.constant 0 : index
    %33 = vector.load %arg5[%c3, %c0_25, %c0_26] : memref<7x128x128xbf16, #tpu.memory_space<vmem>>, vector<1x128x128xbf16>
    %34 = vector.shape_cast %33 : vector<1x128x128xbf16> to vector<128x128xbf16>
    %cst_27 = arith.constant dense<0.000000e+00> : vector<16x128xf32>
    %35 = tpu.matmul %32, %34, %cst_27 {dimension_numbers = #tpu.dot_dimension_numbers<[1], [0], [0], [1], [0, 0, 1, 1], [], []>} : vector<16x128xbf16>, vector<128x128xbf16>, vector<16x128xf32> -> vector<16x128xf32>
    %36 = arith.addf %31, %35 : vector<16x128xf32>
    %c17 = arith.constant 17 : index
    %c0_28 = arith.constant 0 : index
    %37 = vector.load %arg10[%c17, %c0_28] : memref<48x128xbf16, #tpu.memory_space<vmem>>, vector<16x128xbf16>
    %c4 = arith.constant 4 : index
    %c0_29 = arith.constant 0 : index
    %c0_30 = arith.constant 0 : index
    %38 = vector.load %arg5[%c4, %c0_29, %c0_30] : memref<7x128x128xbf16, #tpu.memory_space<vmem>>, vector<1x128x128xbf16>
    %39 = vector.shape_cast %38 : vector<1x128x128xbf16> to vector<128x128xbf16>
    %cst_31 = arith.constant dense<0.000000e+00> : vector<16x128xf32>
    %40 = tpu.matmul %37, %39, %cst_31 {dimension_numbers = #tpu.dot_dimension_numbers<[1], [0], [0], [1], [0, 0, 1, 1], [], []>} : vector<16x128xbf16>, vector<128x128xbf16>, vector<16x128xf32> -> vector<16x128xf32>
    %41 = arith.addf %36, %40 : vector<16x128xf32>
    %c18 = arith.constant 18 : index
    %c0_32 = arith.constant 0 : index
    %42 = vector.load %arg10[%c18, %c0_32] : memref<48x128xbf16, #tpu.memory_space<vmem>>, vector<16x128xbf16>
    %c5 = arith.constant 5 : index
    %c0_33 = arith.constant 0 : index
    %c0_34 = arith.constant 0 : index
    %43 = vector.load %arg5[%c5, %c0_33, %c0_34] : memref<7x128x128xbf16, #tpu.memory_space<vmem>>, vector<1x128x128xbf16>
    %44 = vector.shape_cast %43 : vector<1x128x128xbf16> to vector<128x128xbf16>
    %cst_35 = arith.constant dense<0.000000e+00> : vector<16x128xf32>
    %45 = tpu.matmul %42, %44, %cst_35 {dimension_numbers = #tpu.dot_dimension_numbers<[1], [0], [0], [1], [0, 0, 1, 1], [], []>} : vector<16x128xbf16>, vector<128x128xbf16>, vector<16x128xf32> -> vector<16x128xf32>
    %46 = arith.addf %41, %45 : vector<16x128xf32>
    %c19 = arith.constant 19 : index
    %c0_36 = arith.constant 0 : index
    %47 = vector.load %arg10[%c19, %c0_36] : memref<48x128xbf16, #tpu.memory_space<vmem>>, vector<16x128xbf16>
    %c6 = arith.constant 6 : index
    %c0_37 = arith.constant 0 : index
    %c0_38 = arith.constant 0 : index
    %48 = vector.load %arg5[%c6, %c0_37, %c0_38] : memref<7x128x128xbf16, #tpu.memory_space<vmem>>, vector<1x128x128xbf16>
    %49 = vector.shape_cast %48 : vector<1x128x128xbf16> to vector<128x128xbf16>
    %cst_39 = arith.constant dense<0.000000e+00> : vector<16x128xf32>
    %50 = tpu.matmul %47, %49, %cst_39 {dimension_numbers = #tpu.dot_dimension_numbers<[1], [0], [0], [1], [0, 0, 1, 1], [], []>} : vector<16x128xbf16>, vector<128x128xbf16>, vector<16x128xf32> -> vector<16x128xf32>
    %51 = arith.addf %46, %50 : vector<16x128xf32>
    %cst_40 = arith.constant dense<0.000000e+00> : vector<16xf32>
    %52 = vector.multi_reduction <add>, %51, %cst_40 [1] : vector<16x128xf32> to vector<16xf32>
    %53 = vector.shape_cast %52 : vector<16xf32> to vector<16x1xf32>
    %cst_41 = arith.constant 0.010416667 : f32
    %54 = vector.broadcast %cst_41 : f32 to vector<16x1xf32>
    %55 = arith.mulf %53, %54 : vector<16x1xf32>
    %56 = vector.broadcast %55 : vector<16x1xf32> to vector<16x128xf32>
    %57 = arith.subf %51, %56 : vector<16x128xf32>
    %58 = tpu.iota {dimensions = array<i32: 1>} : vector<16x128xi32>
    %c96_i32 = arith.constant 96 : i32
    %59 = vector.broadcast %c96_i32 : i32 to vector<16x128xi32>
    %60 = arith.cmpi slt, %58, %59 : vector<16x128xi32>
    %cst_42 = arith.constant 0.000000e+00 : f32
    %61 = vector.broadcast %cst_42 : f32 to vector<16x128xf32>
    %62 = arith.select %60, %57, %61 : vector<16x128xi1>, vector<16x128xf32>
    %63 = arith.mulf %62, %62 : vector<16x128xf32>
    %cst_43 = arith.constant dense<0.000000e+00> : vector<16xf32>
    %64 = vector.multi_reduction <add>, %63, %cst_43 [1] : vector<16x128xf32> to vector<16xf32>
    %65 = vector.shape_cast %64 : vector<16xf32> to vector<16x1xf32>
    %cst_44 = arith.constant 0.010416667 : f32
    %66 = vector.broadcast %cst_44 : f32 to vector<16x1xf32>
    %67 = arith.mulf %65, %66 : vector<16x1xf32>
    %cst_45 = arith.constant 9.99999974E-6 : f32
    %68 = vector.broadcast %cst_45 : f32 to vector<16x1xf32>
    %69 = arith.addf %67, %68 : vector<16x1xf32>
    %70 = math.rsqrt %69 : vector<16x1xf32>
    %71 = vector.broadcast %70 : vector<16x1xf32> to vector<16x128xf32>
    %72 = arith.mulf %62, %71 : vector<16x128xf32>
    %c0_46 = arith.constant 0 : index
    %c0_47 = arith.constant 0 : index
    %73 = vector.load %arg7[%c0_46, %c0_47] : memref<1x128xf32, #tpu.memory_space<vmem>>, vector<1x128xf32>
    %74 = vector.broadcast %73 : vector<1x128xf32> to vector<16x128xf32>
    %75 = arith.mulf %72, %74 : vector<16x128xf32>
    %c0_48 = arith.constant 0 : index
    %c0_49 = arith.constant 0 : index
    %76 = vector.load %arg8[%c0_48, %c0_49] : memref<1x128xf32, #tpu.memory_space<vmem>>, vector<1x128xf32>
    %77 = vector.broadcast %76 : vector<1x128xf32> to vector<16x128xf32>
    %78 = arith.addf %75, %77 : vector<16x128xf32>
    %c0_50 = arith.constant 0 : index
    %c0_51 = arith.constant 0 : index
    %c0_52 = arith.constant 0 : index
    %79 = vector.load %arg9[%c0_50, %c0_51, %c0_52] : memref<1x16x128xf32, #tpu.memory_space<vmem>>, vector<1x16x128xf32>
    %80 = vector.shape_cast %79 : vector<1x16x128xf32> to vector<16x128xf32>
    %81 = vector.shape_cast %78 : vector<16x128xf32> to vector<1x16x128xf32>
    tpu.vector_store %arg9[%c0_50, %c0_51, %c0_52], %81 {strides = array<i32>} : memref<1x16x128xf32, #tpu.memory_space<vmem>>, vector<1x16x128xf32>,
    return
  }
  func.func @transform_0(%arg0: i32, %arg1: i32) -> (i32, i32, i32) {
    %c1_i32 = arith.constant 1 : i32
    %0 = arith.muli %arg1, %c1_i32 : i32
    %c1_i32_0 = arith.constant 1 : i32
    %1 = arith.subi %0, %c1_i32_0 : i32
    %c0_i32 = arith.constant 0 : i32
    %2 = arith.maxsi %1, %c0_i32 : i32
    %c0_i32_1 = arith.constant 0 : i32
    %c0_i32_2 = arith.constant 0 : i32
    return %arg0, %2, %c0_i32_1 : i32, i32, i32
  }
  func.func @transform_1(%arg0: i32, %arg1: i32) -> (i32, i32, i32) {
    %c0_i32 = arith.constant 0 : i32
    %c0_i32_0 = arith.constant 0 : i32
    return %arg0, %arg1, %c0_i32 : i32, i32, i32
  }
  func.func @transform_2(%arg0: i32, %arg1: i32) -> (i32, i32, i32) {
    %c1_i32 = arith.constant 1 : i32
    %0 = arith.addi %arg1, %c1_i32 : i32
    %c1_i32_0 = arith.constant 1 : i32
    %1 = arith.muli %0, %c1_i32_0 : i32
    %c1_i32_1 = arith.constant 1 : i32
    %2 = arith.minsi %1, %c1_i32_1 : i32
    %c0_i32 = arith.constant 0 : i32
    %c0_i32_2 = arith.constant 0 : i32
    return %arg0, %2, %c0_i32 : i32, i32, i32
  }
  func.func @transform_3(%arg0: i32, %arg1: i32) -> (i32, i32, i32) {
    %c0_i32 = arith.constant 0 : i32
    %c0_i32_0 = arith.constant 0 : i32
    %c0_i32_1 = arith.constant 0 : i32
    %c0_i32_2 = arith.constant 0 : i32
    return %c0_i32, %c0_i32_0, %c0_i32_1 : i32, i32, i32
  }
  func.func @transform_4(%arg0: i32, %arg1: i32) -> (i32, i32) {
    %c0_i32 = arith.constant 0 : i32
    %c0_i32_0 = arith.constant 0 : i32
    %c0_i32_1 = arith.constant 0 : i32
    return %c0_i32, %c0_i32_0 : i32, i32
  }
  func.func @transform_5(%arg0: i32, %arg1: i32) -> (i32, i32) {
    %c0_i32 = arith.constant 0 : i32
    %c0_i32_0 = arith.constant 0 : i32
    %c0_i32_1 = arith.constant 0 : i32
    return %c0_i32, %c0_i32_0 : i32, i32
  }
  func.func @transform_6(%arg0: i32, %arg1: i32) -> (i32, i32) {
    %c0_i32 = arith.constant 0 : i32
    %c0_i32_0 = arith.constant 0 : i32
    %c0_i32_1 = arith.constant 0 : i32
    return %c0_i32, %c0_i32_0 : i32, i32
  }
  func.func @transform_7(%arg0: i32, %arg1: i32) -> (i32, i32, i32) {
    %c0_i32 = arith.constant 0 : i32
    %c0_i32_0 = arith.constant 0 : i32
    return %arg0, %arg1, %c0_i32 : i32, i32, i32
  }
}

</mosaic_0001>

<bundles_post_ra>
// kernel: tpu_custom_call.1
= control target key start
LH: loop header
LB: loop body
LE: loop exit
PB: predicated region body
PF: predicated region fallthrough
CT: control target
= control target key end

     0   :  { %s3023_s0 = inlined_call_operand.hbm [shape: bf16[2,32,128], index: 0, kind: input, shape index: {}]   ;;  %s3024_s1 = inlined_call_operand.hbm [shape: bf16[2,32,128], index: 1, kind: input, shape index: {}]   ;;  %s3025_s2 = inlined_call_operand.hbm [shape: bf16[2,32,128], index: 2, kind: input, shape index: {}]   ;;  %s3026_s3 = inlined_call_operand.hbm [shape: bf16[7,128,128], index: 3, kind: input, shape index: {}]   ;;  %s3027_s4 = inlined_call_operand.vmem [shape: f32[1,128], index: 4, kind: input, shape index: {}]   ;;  %s3028_s5 = inlined_call_operand.vmem [shape: f32[1,128], index: 5, kind: input, shape index: {}]   ;;  %s3029_s6 = inlined_call_operand.vmem [shape: f32[1,128], index: 6, kind: input, shape index: {}]   ;;  %s3030_s7 = inlined_call_operand.hbm [shape: f32[2,32,128], index: 7, kind: output, shape index: {}]  }
   0x1   :  { %3056 = sst [smem:[#allocation26_spill]] %s3024_s1 }
   0x2   :  { %3057 = sst [smem:[#allocation27_spill]] %s3025_s2 }
   0x3   :  { %3058 = sst [smem:[#allocation28_spill]] %s3026_s3 }
   0x4   :  { %3059 = sst [smem:[#allocation29_spill]] %s3027_s4 }
   0x5   :  { %3060 = sst [smem:[#allocation30_spill]] %s3028_s5 }
   0x6   :  { %3061 = sst [smem:[#allocation31_spill]] %s3029_s6 }
   0x7   :  { %3062 = sst [smem:[#allocation32_spill]] %s3030_s7 }
   0x8   :  { %12 = vsyncpa [#allocation4], 0 }
   0x9   :  { %14 = vsyncpa [#allocation4 + $0x1], 0 }
   0xa   :  { %15 = vsyncpa [#allocation7], 0 }
   0xb   :  { %17 = vsyncpa [#allocation7 + $0x1], 0 }
   0xc   :  { %18 = vsyncpa [#allocation10], 0 }
   0xd   :  { %19 = vsyncpa [#allocation5], 0 }
   0xe   :  { %21 = vsyncpa [#allocation5 + $0x1], 0  ;;  %s2433_s24 = smov 0   ;;  %s2435_s25 = smov 0  }
   0xf   :  { %s2437_s26 = smov 0   ;;  %s2439_s27 = smov 0  }
  0x10   :  { %s2441_s28 = smov 0   ;;  %s2443_s29 = smov 0  }
  0x11   :  { %s2445_s30 = smov 0   ;;  %s2447_s8 = smov 0  }
  0x12   :  { %s2449_s9 = smov 0   ;;  %s2451_s10 = smov 0  }
  0x13   :  { %s2453_s11 = smov 0   ;;  %s2455_s12 = smov 0  }
  0x14   :  { %s2457_s13 = smov 0   ;;  %s2459_s14 = smov 0  }
  0x15 LB: > { %3063 = sst [smem:[#allocation17_spill]] %s2340_s27  ;;  %s1562_s15 = sadd.s32 4294967294, %s2380_s14   ;;  %s2380_s14 = sphi %s2459_s14, %s27_s14   ;;  %s2376_s13 = sphi %s2457_s13, %s3138_s13   ;;  %s2372_s12 = sphi %s2455_s12, %s3137_s12   ;;  %s2368_s11 = sphi %s2453_s11, %s3136_s11   ;;  %s2364_s10 = sphi %s2451_s10, %s3123_s10   ;;  %s2360_s9 = sphi %s2449_s9, %s3135_s9   ;;  %s2356_s8 = sphi %s2447_s8, %s3134_s8   ;;  %s2352_s30 = sphi %s2445_s30, %s3133_s30   ;;  %s2348_s29 = sphi %s2443_s29, %s3132_s29   ;;  %s2344_s28 = sphi %s2441_s28, %s3131_s28   ;;  %s2340_s27 = sphi %s2439_s27, %s3130_s27   ;;  %s2336_s26 = sphi %s2437_s26, %s3129_s26   ;;  %s2332_s25 = sphi %s2435_s25, %s3128_s25   ;;  %s2328_s24 = sphi %s2433_s24, %s3127_s24  }
  0x16   : > { %3064 = sst [smem:[#allocation18_spill]] %s2364_s10  ;;  %s36_s16 = sadd.s32 1, %s2372_s12 }
  0x17   : > { %3065 = sst [smem:[#allocation19_spill]] %s2368_s11  ;;  %p37_p0 = scmp.ge.s32.totalorder %s36_s16, 2 }
  0x18   : > { %3066 = sst [smem:[#allocation20_spill]] %s2372_s12  ;;  %s39_s17 = sadd.s32 1, %s2376_s13 }
  0x19   : > { %p3034_p1 = scmp.eq.s32.totalorder %s2380_s14, 0  ;;  %s3140_s16 = smov (%p37_p0, %s36_s16), 0 }
  0x1a   : > { %3067 = sst [smem:[#allocation21_spill]] %s3140_s16  ;;  %s3142_s17 = smov (!%p37_p0, %s39_s17), %s2376_s13 }
  0x1b   : > { %p3035_p2 = scmp.ne.s32.totalorder %s2348_s29, %s2344_s28  ;;  %p3036_p3 = scmp.ne.s32.totalorder %s2344_s28, %s2340_s27 }
  0x1c   : > { %p245_p4 = scmp.eq.s32.totalorder %s1562_s15, 3  ;;  %p3033_p7 = scmp.lt.s32.totalorder %s2380_s14, 4 }
  0x1d   : > { %p2524_p5 = por %p3035_p2, %p3034_p1  ;;  %s1571_s22 = sshll.u32 %s2376_s13, 2 }
  0x1e   : > { %p2531_p6 = por %p245_p4, %p3036_p3  ;;  %s313_s23 = sand.u32 1, %s2380_s14  }
  0x1f   : > { %s315_s18 = sand.u32 1, %s2348_s29   ;;  %s1574_s7 = sshll.u32 %s2372_s12, 1 }
  0x20   : > { %s3069_s21 = scalar_select %p2531_p6, 1, 0 }
  0x21   : > { %s1573_s19 = sshll.u32 %s315_s18, 3  ;;  %s323_s6 = sadd.s32 %s1574_s7, %s1571_s22 }
  0x22   : > { %3070 = sst [smem:[#allocation22_spill]] %s3069_s21  ;;  %s1576_s15 = sshll.u32 %s323_s6, 6 }
  0x23   : > { %s317_s5 = scalar_lea.vmem [#allocation6], %s1573_s19  ;;  %s3071_s1 = sld [smem:[#allocation26_spill]] }
  0x24   : > { %s326_s11 = sshll.u32 %s317_s5, 4  ;;  %p2551_p8 = pnand %p3033_p7, %p2524_p5  ;;  %s2545_s11 = int_to_ptr.vmem [resolvable:$true] %s326_s11 }
  0x25   : > { %s2555_s5 = scalar_lea.sflag [#allocation7], %s313_s23 }
  0x26   : > { %p2102_p10 = pneg %p2551_p8 }
  0x29   : > { %s2543_s2 = scalar_lea.hbm %s3071_s1, %s1576_s15  ;;  %s2105_s10 = scalar_lea.hbm %s3071_s1, 512 }
  0x2a   : > { %s2100_s6 = scalar_lea.hbm %s2543_s2, 128  ;;  %p2106_p13 = scmp.lt.u32.totalorder %s2543_s2, %s3071_s1 }
  0x2b   : > { %p2101_p9 = scmp.ne.s32.totalorder %s2543_s2, %s2100_s6  ;;  %p2107_p0 = scmp.lt.u32.totalorder %s2105_s10, %s2100_s6 }
  0x2c   : > { %p2109_p5 = scmp.lt.u32.totalorder %s2100_s6, %s2543_s2 }
  0x2d   : > { %p2103_p11 = pnand %p2102_p10, %p2101_p9  ;;  %p2108_p4 = por %p2107_p0, %p2106_p13 }
  0x2f   : > { %p2104_p12 = pneg %p2103_p11  ;;  %p2110_p7 = por %p2109_p5, %p2108_p4 }
  0x31   : > { %p2111_p1 = pnand %p2110_p7, %p2104_p12 }
  0x33   : > { %2114 = shalt.err (!%p2111_p1)
}
  0x34   : > { %s2115_s22 = scalar_lea.vmem %s2545_s11, 128  ;;  %s2382_s23 = smov [#allocation6]  }
  0x35   : > { %p2116_p9 = scmp.ne.s32.totalorder %s2545_s11, %s2115_s22  ;;  %s2120_s15 = sshll.u32 %s2382_s23, 4  ;;  %s2121_s15 = int_to_ptr.vmem [resolvable:$false] %s2120_s15 }
  0x36   : > { %s2122_s4 = scalar_lea.vmem %s2121_s15, 256  ;;  %p2123_p3 = scmp.lt.s32.totalorder %s2545_s11, %s2121_s15 }
  0x37   : > { %p2118_p11 = pnand %p2116_p9, %p2102_p10  ;;  %p2124_p13 = scmp.lt.s32.totalorder %s2122_s4, %s2115_s22 }
  0x39   : > { %p2119_p2 = pneg %p2118_p11  ;;  %p2125_p0 = por %p2124_p13, %p2123_p3 }
  0x3b   : > { %p2126_p4 = pnand %p2125_p0, %p2119_p2 }
  0x3d   : > { %2129 = shalt.err (!%p2126_p4)
}
  0x3e   : > { %s3037_s6 = smov 64   ;;  %s3039_s7 = smov 4  }
  0x3f   : > { %1907 = dma.hbm_to_vmem [thread:$0]  (!%p2551_p8), %s2543_s2, 128, %s2545_s11, %s2555_s5, %s3037_s6, %s3037_s6, %s3039_s7  }
  0x40   : > { %s2587_s10 = sadd.s32 4294967295, %s2380_s14   ;;  %p1565_p1 = scmp.ge.s32.totalorder %s2380_s14, 1 }
  0x41   : > { %p3042_p2 = scmp.eq.s32.totalorder %s2587_s10, 0  ;;  %p239_p3 = scmp.eq.s32.totalorder %s2587_s10, 3 }
  0x42   : > { %p252_p7 = scmp.lt.s32.totalorder %s2380_s14, 5  ;;  %p3073_p10 = scmp.ne.s32.totalorder %s2344_s28, %s2340_s27 }
  0x43   : > { %p3076_p5 = scmp.ne.s32.totalorder %s2348_s29, %s2344_s28  ;;  %s2385_s11 = smov [#allocation9]  }
  0x44   : > { %p2598_p12 = por %p3073_p10, %p3042_p2  ;;  %p2609_p8 = pnand %p1565_p1, %p252_p7 }
  0x45   : > { %p2605_p9 = por %p239_p3, %p3076_p5  ;;  %s264_s20 = sshll.u32 %s2385_s11, 4  ;;  %s265_s20 = int_to_ptr.vmem [resolvable:$true] %s264_s20 }
  0x46   : > { %s3074_s19 = scalar_select %p2598_p12, 1, 0 }
  0x47   : > { %s3077_s18 = scalar_select %p2605_p9, 1, 0 }
  0x48   : > { %3075 = sst [smem:[#allocation23_spill]] %s3074_s19  ;;  %p1897_p11 = pneg %p2609_p8 }
  0x49   : > { %3078 = sst [smem:[#allocation24_spill]] %s3077_s18  ;;  %s3081_s3 = sld [smem:[#allocation28_spill]] }
  0x4a   : > { %s3079_s2 = scalar_select %p2609_p8, 1, 0 }
  0x4b   : > { %p2617_p13 = pnand %p1897_p11, %p3042_p2 }
  0x4d   : > { %p2132_p1 = pneg %p2617_p13 }
  0x4f   : > { %s2130_s4 = scalar_lea.hbm %s3081_s3, 7168 }
  0x50   : > { %p2131_p4 = scmp.ne.s32.totalorder %s3081_s3, %s2130_s4  ;;  %p2137_p10 = scmp.lt.u32.totalorder %s2130_s4, %s3081_s3 }
  0x52   : > { %p2133_p3 = pnand %p2132_p1, %p2131_p4 }
  0x54   : > { %p2134_p7 = pneg %p2133_p3 }
  0x56   : > { %p2139_p5 = pnand %p2137_p10, %p2134_p7 }
  0x58   : > { %2142 = shalt.err (!%p2139_p5)
}
  0x59   : > { %s2143_s21 = scalar_lea.vmem %s265_s20, 7168  ;;  %p2151_p6 = scmp.lt.s32.totalorder %s265_s20, %s265_s20 }
  0x5a   : > { %p2144_p11 = scmp.ne.s32.totalorder %s265_s20, %s2143_s21  ;;  %p2152_p9 = scmp.lt.s32.totalorder %s2143_s21, %s2143_s21 }
  0x5c   : > { %p2146_p2 = pnand %p2144_p11, %p2132_p1  ;;  %p2153_p12 = por %p2152_p9, %p2151_p6 }
  0x5e   : > { %p2147_p0 = pneg %p2146_p2 }
  0x60   : > { %p2154_p8 = pnand %p2153_p12, %p2147_p0 }
  0x62   : > { %2157 = shalt.err (!%p2154_p8)
}
  0x63   : > { %s3082_s6 = smov 4   ;;  %s3083_s7 = smov 64  }
  0x64   : > { %1900 = dma.hbm_to_vmem [thread:$0]  (!%p2617_p13), %s3081_s3, 7168, %s265_s20, [#allocation10], %s3083_s7, %s3083_s7, %s3082_s6  }
  0x65   : > { %p3084_p6 = scmp.ge.s32.totalorder %s3142_s17, 2  ;;  %s54_s21 = sadd.s32 1, %s2360_s9 }
  0x66   : > { %p61_p2 = scmp.ne.s32.totalorder %s2360_s9, %s2356_s8  ;;  %p67_p12 = scmp.ne.s32.totalorder %s2356_s8, %s2352_s30 }
  0x67   : > { %s3144_s17 = smov (%p3084_p6, %s3142_s17), 0  ;;  %s3086_s22 = ssub.s32 %s2372_s12, %s3140_s16 }
  0x68   : > { %3085 = sst [smem:[#allocation25_spill]] %s3144_s17  ;;  %s2648_s1 = ssub.s32 %s2376_s13, %s3144_s17 }
  0x69   : > { %s79_s4 = sor.u32 %s3086_s22, %s2648_s1  ;;  %p3087_p9 = scmp.eq.s32.totalorder %s2380_s14, 0 }
  0x6a   : > { %p3054_p13 = scmp.eq.s32.totalorder %s2648_s1, 0  ;;  %p3089_p0 = scmp.eq.s32.totalorder %s2587_s10, 0 }
  0x6b   : > { %p2661_p8 = por %p3087_p9, %p61_p2  ;;  %p80_p1 = scmp.eq.s32.totalorder %s79_s4, 0 }
  0x6c   : > { %p2668_p4 = por %p3089_p0, %p67_p12  ;;  %s287_s23 = sand.u32 1, %s2360_s9  }
  0x6d   : > { %s2676_s15 = scalar_select %p3054_p13, %s2360_s9, %s54_s21  }
  0x6e   : > { %s3091_s30 = sadd.s32 1, %s2348_s29  ;;  %s1568_s22 = sshll.u32 %s287_s23, 3 }
  0x6f   : > { %s2681_s3 = scalar_select %p80_p1, %s2348_s29, %s3091_s30  }
  0x70   : > { %s291_s17 = scalar_lea.vmem [#allocation3], %s1568_s22  ;;  %s2322_s12 = sshll.u32 %s2376_s13, 8 }
  0x71   : > { %s303_s16 = sshll.u32 %s291_s17, 4  ;;  %s2691_s19 = scalar_lea.hbm %s3023_s0, %s2322_s12  ;;  %s2684_s16 = int_to_ptr.vmem [resolvable:$true] %s303_s16 }
  0x72   : > { %p3092_p3 = scmp.lt.s32.totalorder %s2380_s14, 4  ;;  %s2701_s17 = scalar_lea.sflag [#allocation4], %s287_s23 }
  0x73   : > { %s2158_s4 = scalar_lea.hbm %s2691_s19, 128  ;;  %s2163_s20 = scalar_lea.hbm %s3023_s0, 512 }
  0x74   : > { %p2697_p7 = pnand %p3092_p3, %p2661_p8  ;;  %p2159_p10 = scmp.ne.s32.totalorder %s2691_s19, %s2158_s4 }
  0x75   : > { %p2164_p2 = scmp.lt.u32.totalorder %s2691_s19, %s3023_s0  ;;  %p2165_p12 = scmp.lt.u32.totalorder %s2163_s20, %s2158_s4 }
  0x76   : > { %p2160_p5 = pneg %p2697_p7  ;;  %p2167_p8 = scmp.lt.u32.totalorder %s2158_s4, %s2691_s19 }
  0x77   : > { %p2166_p9 = por %p2165_p12, %p2164_p2 }
  0x78   : > { %p2161_p11 = pnand %p2160_p5, %p2159_p10 }
  0x79   : > { %p2168_p0 = por %p2167_p8, %p2166_p9 }
  0x7a   : > { %p2162_p6 = pneg %p2161_p11 }
  0x7c   : > { %p2169_p1 = pnand %p2168_p0, %p2162_p6 }
  0x7e   : > { %2172 = shalt.err (!%p2169_p1)
}
  0x7f   : > { %s2173_s23 = scalar_lea.vmem %s2684_s16, 128  ;;  %s2386_s27 = smov [#allocation3]  }
  0x80   : > { %p2174_p3 = scmp.ne.s32.totalorder %s2684_s16, %s2173_s23  ;;  %s2178_s18 = sshll.u32 %s2386_s27, 4  ;;  %s2179_s18 = int_to_ptr.vmem [resolvable:$false] %s2178_s18 }
  0x81   : > { %s2180_s30 = scalar_lea.vmem %s2179_s18, 256  ;;  %p2181_p13 = scmp.lt.s32.totalorder %s2684_s16, %s2179_s18 }
  0x82   : > { %p2176_p10 = pnand %p2174_p3, %p2160_p5  ;;  %p2182_p2 = scmp.lt.s32.totalorder %s2180_s30, %s2173_s23 }
  0x84   : > { %p2177_p11 = pneg %p2176_p10  ;;  %p2183_p12 = por %p2182_p2, %p2181_p13 }
  0x86   : > { %p2184_p9 = pnand %p2183_p12, %p2177_p11 }
  0x88   : > { %2187 = shalt.err (!%p2184_p9)
}
  0x89   : > { %1904 = dma.hbm_to_vmem [thread:$0]  (!%p2697_p7), %s2691_s19, 128, %s2684_s16, %s2701_s17, %s3083_s7, %s3083_s7, %s3082_s6  }
  0x8a   : > { %s116_s21 = sadd.s32 1, %s2336_s26  ;;  %p123_p13 = scmp.ne.s32.totalorder %s2336_s26, %s2332_s25 }
  0x8b   : > { %p129_p5 = scmp.ne.s32.totalorder %s2332_s25, %s2328_s24  ;;  %s338_s4 = sand.u32 1, %s2336_s26  }
  0x8c   : > { %p3094_p6 = scmp.eq.s32.totalorder %s2380_s14, 0  ;;  %p3095_p0 = scmp.eq.s32.totalorder %s2587_s10, 0 }
  0x8d   : > { %s1577_s22 = sshll.u32 %s338_s4, 3  ;;  %p3097_p3 = scmp.eq.s32.totalorder %s2648_s1, 0 }
  0x8e   : > { %p125_p8 = por %p123_p13, %p3094_p6  ;;  %p2742_p1 = por %p129_p5, %p3095_p0 }
  0x8f   : > { %s340_s23 = scalar_lea.vmem [#allocation8], %s1577_s22  ;;  %s2324_s30 = sadd.s32 128, %s2322_s12 }
  0x90   : > { %s3096_s20 = scalar_select %p2742_p1, 1, 0 }
  0x91   : > { %s352_s27 = sshll.u32 %s340_s23, 4  ;;  %s3098_s19 = sld [smem:[#allocation27_spill]]  ;;  %s2753_s27 = int_to_ptr.vmem [resolvable:$true] %s352_s27 }
  0x92   : > { %s2749_s18 = scalar_select %p3097_p3, %s2336_s26, %s116_s21  }
  0x93   : > { %p3099_p7 = scmp.lt.s32.totalorder %s2380_s14, 4 }
  0x95   : > { %p2762_p10 = pnand %p3099_p7, %p125_p8 }
  0x97   : > { %s2758_s17 = scalar_lea.hbm %s3098_s19, %s2324_s30  ;;  %p2190_p2 = pneg %p2762_p10 }
  0x98   : > { %s2188_s1 = scalar_lea.hbm %s2758_s17, 128  ;;  %s2193_s22 = scalar_lea.hbm %s3098_s19, 512 }
  0x99   : > { %p2189_p11 = scmp.ne.s32.totalorder %s2758_s17, %s2188_s1  ;;  %p2194_p13 = scmp.lt.u32.totalorder %s2758_s17, %s3098_s19 }
  0x9a   : > { %p2195_p5 = scmp.lt.u32.totalorder %s2193_s22, %s2188_s1  ;;  %p2197_p8 = scmp.lt.u32.totalorder %s2188_s1, %s2758_s17 }
  0x9b   : > { %p2191_p12 = pnand %p2190_p2, %p2189_p11 }
  0x9c   : > { %p2196_p6 = por %p2195_p5, %p2194_p13 }
  0x9d   : > { %p2192_p9 = pneg %p2191_p12 }
  0x9e   : > { %p2198_p0 = por %p2197_p8, %p2196_p6 }
  0xa0   : > { %p2199_p3 = pnand %p2198_p0, %p2192_p9 }
  0xa2   : > { %2202 = shalt.err (!%p2199_p3)
}
  0xa3   : > { %s2203_s16 = scalar_lea.vmem %s2753_s27, 128  ;;  %s2387_s24 = smov [#allocation8]  }
  0xa4   : > { %p2204_p7 = scmp.ne.s32.totalorder %s2753_s27, %s2203_s16  ;;  %s2208_s12 = sshll.u32 %s2387_s24, 4  ;;  %s2209_s12 = int_to_ptr.vmem [resolvable:$false] %s2208_s12 }
  0xa5   : > { %s2210_s21 = scalar_lea.vmem %s2209_s12, 256  ;;  %p2211_p1 = scmp.lt.s32.totalorder %s2753_s27, %s2209_s12 }
  0xa6   : > { %p2206_p11 = pnand %p2204_p7, %p2190_p2  ;;  %p2212_p13 = scmp.lt.s32.totalorder %s2210_s21, %s2203_s16 }
  0xa8   : > { %p2207_p12 = pneg %p2206_p11  ;;  %p2213_p5 = por %p2212_p13, %p2211_p1 }
  0xaa   : > { %p2214_p6 = pnand %p2213_p5, %p2207_p12 }
  0xac   : > { %2217 = shalt.err (!%p2214_p6)
}
  0xad   : > { %1910 = dma.hbm_to_vmem [thread:$0]  (!%p2762_p10), %s2758_s17, 128, %s2753_s27, %s2555_s5, %s3083_s7, %s3083_s7, %s3082_s6  }
  0xae   : > { %p3101_p2 = scmp.ne.s32.totalorder %s3079_s2, 0 }
  0xaf   : > { %s366_s1 = sand.u32 (!%p3101_p2), 1, %s2356_s8  }
  0xb0   : > { %364 = sbr.rel (%p3101_p2) target bundleno = 935 (0x3a7), region = 48  ;;  %s1582_s22 = sshll.u32 (!%p3101_p2), %s366_s1, 3 }
  0xb1   : > { %s367_s23 = scalar_lea.sflag (!%p3101_p2), [#allocation4], %s366_s1  ;;  %s370_s30 = scalar_lea.vmem (!%p3101_p2), [#allocation3], %s1582_s22 }
  0xb7   : > { %2303 = dma.done.wait (%p2668_p4), %s367_s23, 128  }
  0xb8   : > { %2305 = vsyncadd (%p2668_p4), %s367_s23, 4294967168  ;;  %s3102_s4 = sld [smem:[#allocation23_spill]]  ;;  %s375_s16 = sand.u32 1, %s2587_s10  }
  0xb9   : > { %s2804_s24 = sand.u32 1, %s2344_s28   ;;  %s376_s2 = scalar_lea.sflag [#allocation7], %s375_s16 }
  0xba   : > { %s1583_s5 = sshll.u32 %s2804_s24, 3 }
  0xbb   : > { %s379_s6 = scalar_lea.vmem [#allocation6], %s1583_s5 }
  0xbe   : > { %p3103_p1 = scmp.ne.s32.totalorder %s3102_s4, 0 }
  0xc0   : > { %2307 = dma.done.wait (%p3103_p1), %s376_s2, 128  }
  0xc1   : > { %2309 = vsyncadd (%p3103_p1), %s376_s2, 4294967168  ;;  %s386_s7 = sand.u32 1, %s2332_s25   ;;  %p3104_p4 = scmp.ne.s32.totalorder %s3096_s20, 0 }
  0xc2   : > { %s2812_s11 = sshll.u32 %s386_s7, 3 }
  0xc3   : > { %s388_s27 = scalar_lea.vmem [#allocation8], %s2812_s11 }
  0xc4   : > { %2311 = dma.done.wait (%p3104_p4), %s376_s2, 128  }
  0xc5   : > { %2313 = vsyncadd (%p3104_p4), %s376_s2, 4294967168  ;;  %p3105_p10 = scmp.eq.s32.totalorder %s2587_s10, 0 }
  0xc7   : > { %2315 = dma.done.wait (%p3105_p10), [#allocation10], 7168   ;;  %p3106_p9 = pmov %p3105_p10 }
  0xc8   : > { %s1586_s17 = sshll.u32 %s2804_s24, 4  ;;  %v2038_v0 = vld [vmem:[%s379_s6] sm:$0xff]   ;;  %s3107_s21 = sld [smem:[#allocation18_spill]] }
  0xc9   : > { %2317 = vsyncadd (%p3106_p9), [#allocation10], 4294960128  ;;  %452 = vst [vmem:[#allocation2 + $0x8] sm:$0xff] %v2038_v0  ;;  %s2824_s12 = scalar_lea.vmem [#allocation11], %s1586_s17 }
  0xce   : > { %p1588_p8 = scmp.le.s32.totalorder %s3107_s21, 0 }
  0xcf   : > { %v2039_v1 = vld [vmem:[%s370_s30 + $0x4] ss:$0 sps:$4 sm:$0xff] (!%p1588_p8)   ;;  %vm462_vm0 = vcmask (!%p1588_p8), 1047558   ;;  %vm463_vm1 = vsmask.f32 (!%p1588_p8), 7962 }
  0xd0   : > { %456 = sbr.rel (%p1588_p8) target bundleno = 215 (0xd7), region = 68  ;;  %v465_v2 = vld [vmem:[#allocation2] sm:$0xc0] (!%p1588_p8)  ;;  %vm464_vm2 = vmand (!%p1588_p8), %vm462_vm0, %vm463_vm1 }
  0xd1   : > { %v466_v3 = vsel (!%p1588_p8), %vm464_vm2, %v2039_v1, %v465_v2 }
  0xd2   : > { %467 = vst [vmem:[#allocation2] sm:$0xc0] (!%p1588_p8), %v466_v3 }
  0xd7 PF: > { %s3108_s20 = sld [smem:[#allocation18_spill]] }
  0xdd   : > { %p1590_p0 = scmp.ne.s32.totalorder %s3108_s20, 0 }
  0xde   : > { %vm472_vm3 = vcmask (!%p1590_p0), 1047558   ;;  %vm473_vm4 = vsmask.f32 (!%p1590_p0), 7962  ;;  %v475_v4 = vld [vmem:[#allocation2] sm:$0xc0] (!%p1590_p0) }
  0xdf   : > { %471 = sbr.rel (%p1590_p0) target bundleno = 230 (0xe6), region = 72  ;;  %vm474_vm5 = vmand (!%p1590_p0), %vm472_vm3, %vm473_vm4 }
  0xe0   : > { %v476_v5 = vsel (!%p1590_p0), %vm474_vm5, 0, %v475_v4 }
  0xe1   : > { %477 = vst [vmem:[#allocation2] sm:$0xc0] (!%p1590_p0), %v476_v5 }
  0xe6 PF: > { %s3109_s10 = sld [smem:[#allocation18_spill]] }
  0xec   : > { %p1591_p3 = scmp.ge.s32.totalorder %s3109_s10, 1 }
  0xed   : > { %v482_v6 = vld [vmem:[%s388_s27] sm:$0xf] (!%p1591_p3)  ;;  %vm483_vm6 = vcmask (!%p1591_p3), 1041408   ;;  %vm484_vm7 = vsmask.f32 (!%p1591_p3), 1280 }
  0xee   : > { %481 = sbr.rel (%p1591_p3) target bundleno = 245 (0xf5), region = 76  ;;  %vm485_vm8 = vmand (!%p1591_p3), %vm483_vm6, %vm484_vm7  ;;  %v486_v7 = vld [vmem:[#allocation2 + $0x10] sm:$0x3] (!%p1591_p3) }
  0xef   : > { %v487_v8 = vsel (!%p1591_p3), %vm485_vm8, %v482_v6, %v486_v7 }
  0xf0   : > { %488 = vst [vmem:[#allocation2 + $0x10] sm:$0x3] (!%p1591_p3), %v487_v8 }
  0xf5 PF: > { %s3110_s1 = sld [smem:[#allocation18_spill]] }
  0xfb   : > { %p1592_p7 = scmp.ne.s32.totalorder %s3110_s1, 1 }
  0xfc   : > { %vm493_vm9 = vcmask (!%p1592_p7), 1041408   ;;  %vm494_vm10 = vsmask.f32 (!%p1592_p7), 1280  ;;  %v496_v9 = vld [vmem:[#allocation2 + $0x10] sm:$0x3] (!%p1592_p7) }
  0xfd   : > { %492 = sbr.rel (%p1592_p7) target bundleno = 260 (0x104), region = 80  ;;  %vm495_vm11 = vmand (!%p1592_p7), %vm493_vm9, %vm494_vm10 }
  0xfe   : > { %v497_v10 = vsel (!%p1592_p7), %vm495_vm11, 0, %v496_v9 }
  0xff   : > { %498 = vst [vmem:[#allocation2 + $0x10] sm:$0x3] (!%p1592_p7), %v497_v10 }
 0x104 PF: > { %v2040_v11 = vld [vmem:[#allocation9] sm:$0xff]   ;;  %v2388_v12 = vmov 0.0   ;;  %v2042_v14 = vld [vmem:[#allocation9 + $0x8] sm:$0xff]   ;;  %vm2389_vm12 = vmmov 0   ;;  %v2044_v16 = vld [vmem:[#allocation9 + $0x10] sm:$0xff]   ;;  %vm654_vm14 = vcmask 1040384  }
 0x105   : > { %1721 = vmatprep.subr.bf16.mxu1 %v2388_v12  ;;  %1781 = vmatprep.subr.bf16.mxu0 %v2388_v12  ;;  %v2041_v13 = vld [vmem:[#allocation9 + $0xc0] sm:$0xff]   ;;  %v2043_v15 = vld [vmem:[#allocation9 + $0xc8] sm:$0xff]   ;;  %v2045_v17 = vld [vmem:[#allocation9 + $0xd0] sm:$0xff]   ;;  %vm518_vm13 = vsmask.f32 1280  ;;  %vm1125_vm1 = vcmask 1046528  }
 0x106   : > { %1722 = vmatpush3.bf16.msra.mxu1 %v2040_v11  ;;  %1737 = vmatprep.mubr.msk.bf16.mxu1 %vm2389_vm12, %v2388_v12  ;;  %v2046_v18 = vld [vmem:[#allocation9 + $0x18] sm:$0xff]   ;;  %v2048_v20 = vld [vmem:[#allocation9 + $0x20] sm:$0xff]   ;;  %v2050_v26 = vld [vmem:[#allocation9 + $0x28] sm:$0xff]   ;;  %vm1000_vm15 = vsmask.f32 7424  ;;  %s3111_s30 = sld [smem:[#allocation29_spill]] }
 0x107   : > { %1782 = vmatpush3.bf16.msra.mxu0 %v2041_v13  ;;  %1723 = vmatprep.subr.bf16.mxu1 %v2388_v12  ;;  %v2047_v19 = vld [vmem:[#allocation9 + $0xd8] sm:$0xff]   ;;  %v2049_v21 = vld [vmem:[#allocation9 + $0xe0] sm:$0xff]   ;;  %v2051_v29 = vld [vmem:[#allocation9 + $0xe8] sm:$0xff]   ;;  %vm768_vm0 = vsmask.f32 256  ;;  %s3112_s4 = sld [smem:[#allocation18_spill]] }
 0x108   : > { %1783 = vmatprep.subr.bf16.mxu0 %v2388_v12  ;;  %1797 = vmatprep.mubr.msk.bf16.mxu0 %vm2389_vm12, %v2388_v12  ;;  %v500_v22 = vld [vmem:[#allocation2] sm:$0xc0]  ;;  %v2844_v23 = vld [vmem:[#allocation2 + $0x8] sm:$0x7f]  ;;  %v2052_v30 = vld [vmem:[#allocation9 + $0x30] sm:$0xff]   ;;  %s3113_s16 = sld [smem:[#allocation19_spill]] }
 0x109   : > { %v520_v24 = vshrl.u32 %v500_v22, 16  ;;  %v523_v25 = vshll.u32 %v500_v22, 16  ;;  %v528_v27 = vshrl.u32 %v2844_v23, 16  ;;  %v531_v28 = vshll.u32 %v2844_v23, 16  ;;  %v2053_v35 = vld [vmem:[#allocation9 + $0xf0] sm:$0xff]   ;;  %v2054_v36 = vld [vmem:[#allocation9 + $0x38] sm:$0xff]  }
 0x10a   : > { %1724 = vmatpush3.bf16.msra.mxu1 %v2042_v14  ;;  %v2055_v37 = vld [vmem:[#allocation9 + $0xf8] sm:$0xff]   ;;  %v2056_v40 = vld [vmem:[#allocation9 + $0x40] sm:$0xff]   ;;  %v2058_v44 = vld [vmem:[#allocation9 + $0x48] sm:$0xff]   ;;  %v656_v62 = vrot.slane %v2844_v23, 7  ;;  %vm1239_vm2 = vsmask.f32 6400 }
 0x10b   : > { %1784 = vmatpush3.bf16.msra.mxu0 %v2043_v15  ;;  %1725 = vmatprep.subr.bf16.mxu1 %v2388_v12  ;;  %v522_v31 = vrot.slane %v520_v24, 6  ;;  %v525_v32 = vrot.slane %v523_v25, 7  ;;  %v530_v33 = vrot.slane %v528_v27, 6  ;;  %v533_v34 = vrot.slane %v531_v28, 7  ;;  %v2854_v42 = vld [vmem:[#allocation2 + $0x8] sm:$0xff]  ;;  %v2059_v45 = vld [vmem:[#allocation9 + $0x108] sm:$0xff]  }
 0x10c   : > { %1785 = vmatprep.subr.bf16.mxu0 %v2388_v12  ;;  %v2057_v43 = vld [vmem:[#allocation9 + $0x100] sm:$0xff]   ;;  %v2060_v46 = vld [vmem:[#allocation9 + $0x50] sm:$0xff]   ;;  %v2062_v48 = vld [vmem:[#allocation9 + $0x58] sm:$0xff]   ;;  %v777_v52 = vshll.u32 %v2854_v42, 16  ;;  %v774_v54 = vshrl.u32 %v2854_v42, 16  ;;  %s3114_s11 = sld [smem:[#allocation30_spill]] }
 0x10d   : > { %v526_v38 = vor.u32 %v525_v32, %v522_v31  ;;  %v534_v39 = vor.u32 %v533_v34, %v530_v33  ;;  %v2061_v47 = vld [vmem:[#allocation9 + $0x110] sm:$0xff]   ;;  %v2063_v49 = vld [vmem:[#allocation9 + $0x118] sm:$0xff]   ;;  %v2064_v50 = vld [vmem:[#allocation9 + $0x60] sm:$0xff]   ;;  %s1653_s5 = sshll.u32 %s3112_s4, 1  ;;  %s3115_s21 = sld [smem:[#allocation31_spill]] }
 0x10e   : > { %1726 = vmatpush3.bf16.msra.mxu1 %v2044_v16  ;;  %v2065_v51 = vld [vmem:[#allocation9 + $0x120] sm:$0xff]   ;;  %v2066_v53 = vld [vmem:[#allocation9 + $0x68] sm:$0xff]   ;;  %v2068_v57 = vld [vmem:[#allocation9 + $0x70] sm:$0xff]   ;;  %v1006_v58 = vrot.slane %v777_v52, 1  ;;  %s1654_s2 = sshll.u32 %s3113_s16, 2  ;;  %s3116_s10 = sld [smem:[#allocation24_spill]] }
 0x10f   : > { %1786 = vmatpush3.bf16.msra.mxu0 %v2045_v17  ;;  %1727 = vmatprep.subr.bf16.mxu1 %v2388_v12  ;;  %v535_v41 = vsel %vm518_vm13, %v526_v38, %v534_v39  ;;  %v2067_v55 = vld [vmem:[#allocation9 + $0x128] sm:$0xff]   ;;  %v2879_v59 = vld [vmem:[#allocation2] sm:$0x80]  ;;  %v2069_v60 = vld [vmem:[#allocation9 + $0x130] sm:$0xff]   ;;  %s1409_s20 = sadd.s32 %s1654_s2, %s1653_s5  ;;  %s1412_s22 = sshll.u32 %s2824_s12, 4  ;;  %s2944_s22 = int_to_ptr.vmem [resolvable:$true] %s1412_s22 }
 0x110   : > { %1787 = vmatprep.subr.bf16.mxu0 %v2388_v12  ;;  %v2875_v56 = vld [vmem:[#allocation2 + $0x10] sm:$0x1]  ;;  %v2070_v63 = vld [vmem:[#allocation9 + $0x78] sm:$0xff]   ;;  %v655_v0 = vrot.slane %v2879_v59, 7  ;;  %v1007_v2 = vor.u32 %v1006_v58, %v774_v54  ;;  %v2072_v5 = vld [vmem:[#allocation9 + $0x80] sm:$0xff]   ;;  %s1655_s1 = sshll.u32 %s1409_s20, 7 }
 0x111   : > { %v1009_v61 = vshll.u32 %v2875_v56, 16  ;;  %v2071_v1 = vld [vmem:[#allocation9 + $0x138] sm:$0xff]   ;;  %v2073_v7 = vld [vmem:[#allocation9 + $0x140] sm:$0xff]   ;;  %v2074_v8 = vld [vmem:[#allocation9 + $0x88] sm:$0xff]   ;;  %s3117_s4 = sld [smem:[#allocation32_spill]]  ;;  %s1397_s5 = scalar_lea.sflag [#allocation5], %s2804_s24 }
 0x112   : > { %1728 = vmatpush3.bf16.msra.mxu1 %v2046_v18  ;;  %v657_v4 = vsel %vm654_vm14, %v655_v0, %v656_v62  ;;  %v2075_v9 = vld [vmem:[#allocation9 + $0x148] sm:$0xff]   ;;  %v2076_v10 = vld [vmem:[#allocation9 + $0x90] sm:$0xff]   ;;  %v2078_v13 = vld [vmem:[#allocation9 + $0x98] sm:$0xff]   ;;  %v1357_v0 = vlaneseq  ;;  %s2218_s2 = scalar_lea.vmem %s2944_s22, 256  ;;  %s2390_s6 = smov [#allocation11]  }
 0x113   : > { %1788 = vmatpush3.bf16.msra.mxu0 %v2047_v19  ;;  %1729 = vmatprep.subr.bf16.mxu1 %v2388_v12  ;;  %v1011_v3 = vrot.slane %v1009_v61, 1  ;;  %v2077_v11 = vld [vmem:[#allocation9 + $0x150] sm:$0xff]   ;;  %v2079_v14 = vld [vmem:[#allocation9 + $0x158] sm:$0xff]   ;;  %v2080_v15 = vld [vmem:[#allocation9 + $0xa0] sm:$0xff]   ;;  %v776_v19 = vrot.slane %v774_v54, 7  ;;  %p2219_p11 = scmp.ne.s32.totalorder %s2944_s22, %s2218_s2  ;;  %s2222_s7 = sshll.u32 %s2390_s6, 4  ;;  %s2223_s7 = int_to_ptr.vmem [resolvable:$false] %s2222_s7 }
 0x114   : > { %1789 = vmatprep.subr.bf16.mxu0 %v2388_v12  ;;  %v2081_v16 = vld [vmem:[#allocation9 + $0x160] sm:$0xff]   ;;  %v2082_v17 = vld [vmem:[#allocation9 + $0xa8] sm:$0xff]   ;;  %v2085_v22 = vld [vmem:[#allocation9 + $0x170] sm:$0xff]   ;;  %p3118_p12 = scmp.ne.s32.totalorder %s3116_s10, 0  ;;  %p2225_p6 = scmp.lt.s32.totalorder %s2944_s22, %s2223_s7 }
 0x115   : > { %v1012_v6 = vsel %vm1000_vm15, %v1007_v2, %v1011_v3  ;;  %v2083_v18 = vld [vmem:[#allocation9 + $0x168] sm:$0xff]   ;;  %v1105_v23 = vld [vmem:[#allocation2 + $0x8] sm:$0xfe]  ;;  %v779_v24 = vor.u32 %v777_v52, %v776_v19  ;;  %v2086_v25 = vld [vmem:[#allocation9 + $0xb8] sm:$0xff]  }
 0x116   : > { %1730 = vmatpush3.bf16.msra.mxu1 %v2048_v20  ;;  %v2084_v20 = vld [vmem:[#allocation9 + $0xb0] sm:$0xff]   ;;  %v2087_v27 = vld [vmem:[#allocation9 + $0x178] sm:$0xff]   ;;  %v1126_v28 = vrot.slane %v1105_v23, 1  ;;  %v2088_v32 = vld [vmem:[#allocation9 + $0x180] sm:$0xff]   ;;  %v1241_v39 = vshrl.u32 %v1105_v23, 16  ;;  %p2220_p13 = pnand %p2219_p11, %p3118_p12 }
 0x117   : > { %1790 = vmatpush3.bf16.msra.mxu0 %v2049_v21  ;;  %1731 = vmatprep.subr.bf16.mxu1 %v2388_v12  ;;  %v770_v21 = vshrl.u32 %v2879_v59, 16  ;;  %v2089_v33 = vld [vmem:[#allocation9 + $0x188] sm:$0xff]   ;;  %v2090_v34 = vld [vmem:[#allocation9 + $0x190] sm:$0xff]   ;;  %s2942_s16 = scalar_lea.hbm %s3117_s4, %s1655_s1 }
 0x118   : > { %1791 = vmatprep.subr.bf16.mxu0 %v2388_v12  ;;  %v2093_v38 = vld [vmem:[#allocation9 + $0x1a8] sm:$0xff]   ;;  %p2221_p5 = pneg %p2220_p13 }
 0x11a   : > { %1732 = vmatpush3.bf16.msra.mxu1 %v2050_v26  ;;  %v772_v26 = vrot.slane %v770_v21, 7 }
 0x11b   : > { %1792 = vmatpush3.bf16.msra.mxu0 %v2051_v29  ;;  %1733 = vmatprep.subr.bf16.mxu1 %v2388_v12  ;;  %v1127_v29 = vrot.slane %v2875_v56, 1  ;;  %v1601_v56 = vld [vmem:[%s3111_s30] ss:$0 sm:$0xff] }
 0x11c   : > { %1793 = vmatprep.subr.bf16.mxu0 %v2388_v12 }
 0x11d   : > { %v1128_v31 = vsel %vm1125_vm1, %v1126_v28, %v1127_v29 }
 0x11e   : > { %1734 = vmatpush3.bf16.msra.mxu1 %v2052_v30  ;;  %v780_v30 = vsel %vm768_vm0, %v772_v26, %v779_v24 }
 0x11f   : > { %1794 = vmatpush3.bf16.msra.mxu0 %v2053_v35  ;;  %1735 = vmatprep.subr.bf16.mxu1 %v2388_v12  ;;  %v2091_v35 = vld [vmem:[#allocation9 + $0x198] sm:$0xff]  }
 0x120   : > { %1795 = vmatprep.subr.bf16.mxu0 %v2388_v12 }
 0x122   : > { %1736 = vmatpush3.bf16.msra.mxu1 %v2054_v36  ;;  %v2092_v36 = vld [vmem:[#allocation9 + $0x1a0] sm:$0xff]  }
 0x123   : > { %1796 = vmatpush3.bf16.msra.mxu0 %v2055_v37  ;;  %1741 = vmatprep.subr.bf16.mxu1 %v2388_v12  ;;  %v1221_v37 = vld [vmem:[#allocation2 + $0x10] sm:$0x3] }
 0x124   : > { %1801 = vmatprep.subr.bf16.mxu0 %v2388_v12 }
 0x125   : > { %1738 = vmatmul.mubr.bf16.vlgmr.msra.gmra.mrb[0].mxu1 %v535_v41  ;;  %v1249_v41 = vshrl.u32 %v1221_v37, 16 }
 0x126   : > { %1742 = vmatpush3.bf16.msra.mxu1 %v2056_v40  ;;  %1798 = vmatmul.mubr.bf16.vlgmr.msra.gmra.mrb[0].mxu0 %v2854_v42  ;;  %v1244_v40 = vshll.u32 %v1105_v23, 16  ;;  %v1252_v42 = vshll.u32 %v1221_v37, 16 }
 0x127   : > { %1802 = vmatpush3.bf16.msra.mxu0 %v2057_v43  ;;  %1743 = vmatprep.subr.bf16.mxu1 %v2388_v12  ;;  %v2094_v43 = vld [vmem:[#allocation9 + $0x1b0] sm:$0xff]  }
 0x128   : > { %1803 = vmatprep.subr.bf16.mxu0 %v2388_v12  ;;  %1757 = vmatprep.mubr.msk.bf16.mxu1 %vm2389_vm12, %v2388_v12 }
 0x129   : > { %1817 = vmatprep.mubr.msk.bf16.mxu0 %vm2389_vm12, %v2388_v12 }
 0x12a   : > { %1744 = vmatpush3.bf16.msra.mxu1 %v2058_v44  ;;  %v1243_v44 = vrot.slane %v1241_v39, 1 }
 0x12b   : > { %1804 = vmatpush3.bf16.msra.mxu0 %v2059_v45  ;;  %1745 = vmatprep.subr.bf16.mxu1 %v2388_v12  ;;  %v1246_v45 = vrot.slane %v1244_v40, 2 }
 0x12c   : > { %1805 = vmatprep.subr.bf16.mxu0 %v2388_v12 }
 0x12e   : > { %1746 = vmatpush3.bf16.msra.mxu1 %v2060_v46  ;;  %v1251_v46 = vrot.slane %v1249_v41, 1 }
 0x12f   : > { %1806 = vmatpush3.bf16.msra.mxu0 %v2061_v47  ;;  %1747 = vmatprep.subr.bf16.mxu1 %v2388_v12  ;;  %v1254_v47 = vrot.slane %v1252_v42, 2 }
 0x130   : > { %1807 = vmatprep.subr.bf16.mxu0 %v2388_v12 }
 0x132   : > { %1748 = vmatpush3.bf16.msra.mxu1 %v2062_v48  ;;  %v2095_v48 = vld [vmem:[#allocation9 + $0x1b8] sm:$0xff]  }
 0x133   : > { %1808 = vmatpush3.bf16.msra.mxu0 %v2063_v49  ;;  %1749 = vmatprep.subr.bf16.mxu1 %v2388_v12  ;;  %v1247_v49 = vor.u32 %v1246_v45, %v1243_v44 }
 0x134   : > { %1809 = vmatprep.subr.bf16.mxu0 %v2388_v12 }
 0x136   : > { %1750 = vmatpush3.bf16.msra.mxu1 %v2064_v50  ;;  %v1255_v50 = vor.u32 %v1254_v47, %v1251_v46 }
 0x137   : > { %1810 = vmatpush3.bf16.msra.mxu0 %v2065_v51  ;;  %1751 = vmatprep.subr.bf16.mxu1 %v2388_v12 }
 0x138   : > { %1811 = vmatprep.subr.bf16.mxu0 %v2388_v12  ;;  %v1256_v51 = vsel %vm1239_vm2, %v1247_v49, %v1255_v50 }
 0x13a   : > { %1752 = vmatpush3.bf16.msra.mxu1 %v2066_v53 }
 0x13b   : > { %1812 = vmatpush3.bf16.msra.mxu0 %v2067_v55  ;;  %1753 = vmatprep.subr.bf16.mxu1 %v2388_v12 }
 0x13c   : > { %1813 = vmatprep.subr.bf16.mxu0 %v2388_v12 }
 0x13e   : > { %1754 = vmatpush3.bf16.msra.mxu1 %v2068_v57 }
 0x13f   : > { %1814 = vmatpush3.bf16.msra.mxu0 %v2069_v60  ;;  %1755 = vmatprep.subr.bf16.mxu1 %v2388_v12 }
 0x140   : > { %1815 = vmatprep.subr.bf16.mxu0 %v2388_v12 }
 0x142   : > { %1756 = vmatpush3.bf16.msra.mxu1 %v2070_v63 }
 0x143   : > { %1816 = vmatpush3.bf16.msra.mxu0 %v2071_v1  ;;  %1761 = vmatprep.subr.bf16.mxu1 %v2388_v12  ;;  %v1358_v1 = vand.u32 127, %v1357_v0 }
 0x144   : > { %1821 = vmatprep.subr.bf16.mxu0 %v2388_v12 }
 0x145   : > { %1758 = vmatmul.mubr.bf16.vlgmr.msra.gmra.mrb[0].mxu1 %v657_v4  ;;  %vm1359_vm3 = vcmp.lt.s32.totalorder %v1358_v1, 96 }
 0x146   : > { %1762 = vmatpush3.bf16.msra.mxu1 %v2072_v5  ;;  %1818 = vmatmul.mubr.bf16.vlgmr.msra.gmra.mrb[0].mxu0 %v1012_v6 }
 0x147   : > { %1822 = vmatpush3.bf16.msra.mxu0 %v2073_v7  ;;  %1763 = vmatprep.subr.bf16.mxu1 %v2388_v12 }
 0x148   : > { %1823 = vmatprep.subr.bf16.mxu0 %v2388_v12  ;;  %1777 = vmatprep.mubr.msk.bf16.mxu1 %vm2389_vm12, %v2388_v12 }
 0x149   : > { %1837 = vmatprep.mubr.msk.bf16.mxu0 %vm2389_vm12, %v2388_v12 }
 0x14a   : > { %1764 = vmatpush3.bf16.msra.mxu1 %v2074_v8 }
 0x14b   : > { %1824 = vmatpush3.bf16.msra.mxu0 %v2075_v9  ;;  %1765 = vmatprep.subr.bf16.mxu1 %v2388_v12 }
 0x14c   : > { %1825 = vmatprep.subr.bf16.mxu0 %v2388_v12 }
 0x14e   : > { %1766 = vmatpush3.bf16.msra.mxu1 %v2076_v10 }
 0x14f   : > { %1826 = vmatpush3.bf16.msra.mxu0 %v2077_v11  ;;  %1767 = vmatprep.subr.bf16.mxu1 %v2388_v12 }
 0x150   : > { %1827 = vmatprep.subr.bf16.mxu0 %v2388_v12 }
 0x152   : > { %1768 = vmatpush3.bf16.msra.mxu1 %v2078_v13 }
 0x153   : > { %1828 = vmatpush3.bf16.msra.mxu0 %v2079_v14  ;;  %1769 = vmatprep.subr.bf16.mxu1 %v2388_v12 }
 0x154   : > { %1829 = vmatprep.subr.bf16.mxu0 %v2388_v12 }
 0x156   : > { %1770 = vmatpush3.bf16.msra.mxu1 %v2080_v15 }
 0x157   : > { %1830 = vmatpush3.bf16.msra.mxu0 %v2081_v16  ;;  %1771 = vmatprep.subr.bf16.mxu1 %v2388_v12 }
 0x158   : > { %1831 = vmatprep.subr.bf16.mxu0 %v2388_v12 }
 0x15a   : > { %1772 = vmatpush3.bf16.msra.mxu1 %v2082_v17 }
 0x15b   : > { %1832 = vmatpush3.bf16.msra.mxu0 %v2083_v18  ;;  %1773 = vmatprep.subr.bf16.mxu1 %v2388_v12 }
 0x15c   : > { %1833 = vmatprep.subr.bf16.mxu0 %v2388_v12 }
 0x15e   : > { %1774 = vmatpush3.bf16.msra.mxu1 %v2084_v20  ;;  %v1650_v20 = vld [vmem:[%s3114_s11] ss:$0 sm:$0xff]  ;;  %s2224_s11 = scalar_lea.vmem %s2223_s7, 512 }
 0x15f   : > { %1834 = vmatpush3.bf16.msra.mxu0 %v2085_v22  ;;  %1775 = vmatprep.subr.bf16.mxu1 %v2388_v12  ;;  %v1651_v22 = vld [vmem:[%s3115_s21] ss:$0 sm:$0xff]  ;;  %p2226_p2 = scmp.lt.s32.totalorder %s2224_s11, %s2218_s2 }
 0x160   : > { %1835 = vmatprep.subr.bf16.mxu0 %v2388_v12 }
 0x161   : > { %p2227_p1 = por %p2226_p2, %p2225_p6 }
 0x162   : > { %1776 = vmatpush3.bf16.msra.mxu1 %v2086_v25 }
 0x163   : > { %1836 = vmatpush3.bf16.msra.mxu0 %v2087_v27  ;;  %p2228_p4 = pnand %p2227_p1, %p2221_p5 }
 0x164   : > { %1841 = vmatprep.subr.bf16.mxu0 %v2388_v12 }
 0x165   : > { %1778 = vmatmul.mubr.bf16.vlgmr.msra.gmra.mrb[0].mxu1 %v780_v30 }
 0x166   : > { %1838 = vmatmul.mubr.bf16.vlgmr.msra.gmra.mrb[0].mxu0 %v1128_v31 }
 0x167   : > { %1842 = vmatpush3.bf16.msra.mxu0 %v2088_v32  ;;  %1857 = vmatprep.mubr.msk.bf16.mxu0 %vm2389_vm12, %v2388_v12 }
 0x168   : > { %1843 = vmatprep.subr.bf16.mxu0 %v2388_v12 }
 0x16b   : > { %1844 = vmatpush3.bf16.msra.mxu0 %v2089_v33 }
 0x16c   : > { %1845 = vmatprep.subr.bf16.mxu0 %v2388_v12 }
 0x16f   : > { %1846 = vmatpush3.bf16.msra.mxu0 %v2090_v34 }
 0x170   : > { %1847 = vmatprep.subr.bf16.mxu0 %v2388_v12 }
 0x173   : > { %1848 = vmatpush3.bf16.msra.mxu0 %v2091_v35 }
 0x174   : > { %1849 = vmatprep.subr.bf16.mxu0 %v2388_v12 }
 0x177   : > { %1850 = vmatpush3.bf16.msra.mxu0 %v2092_v36 }
 0x178   : > { %1851 = vmatprep.subr.bf16.mxu0 %v2388_v12 }
 0x17b   : > { %1852 = vmatpush3.bf16.msra.mxu0 %v2093_v38 }
 0x17c   : > { %1853 = vmatprep.subr.bf16.mxu0 %v2388_v12 }
 0x17f   : > { %1854 = vmatpush3.bf16.msra.mxu0 %v2094_v43 }
 0x180   : > { %1855 = vmatprep.subr.bf16.mxu0 %v2388_v12 }
 0x183   : > { %1856 = vmatpush3.bf16.msra.mxu0 %v2095_v48 }
 0x186   : > { %1858 = vmatmul.mubr.bf16.vlgmr.msra.gmra.mrb[0].mxu0 %v1256_v51 }
 0x238   : > { %v864_v52 = vpop.f32.mrb[0].mxu1 }
 0x239   : > { %v1779_v53 = vpop.f32.mrb[1].mxu1  ;;  %v1861_v57 = vadd.f32 %v1601_v56, %v864_v52 }
 0x23a   : > { %v867_v54 = vpop.f32.mrb[2].mxu1 }
 0x23b   : > { %v1780_v55 = vpop.f32.mrb[3].mxu1  ;;  %v1863_v59 = vadd.f32 %v1601_v56, %v867_v54 }
 0x259   : > { %v1340_v58 = vpop.f32.mrb[0].mxu0 }
 0x25a   : > { %v1862_v60 = vadd.f32 %v1861_v57, %v1340_v58  ;;  %v1859_v61 = vpop.f32.mrb[1].mxu0 }
 0x25b   : > { %v1343_v62 = vpop.f32.mrb[2].mxu0 }
 0x25c   : > { %v1864_v63 = vadd.f32 %v1863_v59, %v1343_v62  ;;  %v1860_v12 = vpop.f32.mrb[3].mxu0  ;;  %1349 = vadd.xlane.f32.xlu0 %v1862_v60 }
 0x260   : > { %1351 = vadd.xlane.f32.xlu0 %v1864_v63 }
 0x2e9   : > { %v1350_v2 = vpop.xlane.xlu0 %1349 }
 0x2ea   : > { %v1353_v3 = vmul.f32 0.010416667, %v1350_v2 }
 0x2ec   : > { %v1355_v4 = vsub.f32 %v1862_v60, %v1353_v3 }
 0x2ed   : > { %v1352_v5 = vpop.xlane.xlu0 %1351 }
 0x2ee   : > { %v1354_v6 = vmul.f32 0.010416667, %v1352_v5  ;;  %v1360_v7 = vsel %vm1359_vm3, %v1355_v4, 0.0 }
 0x2ef   : > { %v1362_v8 = vmul.f32 %v1360_v7, %v1360_v7 }
 0x2f0   : > { %v1356_v9 = vsub.f32 %v1864_v63, %v1354_v6 }
 0x2f1   : > { %1364 = vadd.xlane.f32.xlu1 %v1362_v8 }
 0x2f2   : > { %v1361_v10 = vsel %vm1359_vm3, %v1356_v9, 0.0 }
 0x2f3   : > { %v1363_v11 = vmul.f32 %v1361_v10, %v1361_v10 }
 0x2f5   : > { %1366 = vadd.xlane.f32.xlu1 %v1363_v11 }
 0x37e   : > { %v1365_v13 = vpop.xlane.xlu1 %1364 }
 0x37f   : > { %v1368_v14 = vmul.f32 0.010416667, %v1365_v13 }
 0x381   : > { %v1370_v15 = vadd.f32 1e-05, %v1368_v14 }
 0x382   : > { %v1367_v16 = vpop.xlane.xlu1 %1366 }
 0x383   : > { %2096 = vrsqrt.f32 %v1370_v15  ;;  %v1369_v17 = vmul.f32 0.010416667, %v1367_v16 }
 0x385   : > { %v1371_v18 = vadd.f32 1e-05, %v1369_v17 }
 0x387   : > { %2098 = vrsqrt.f32 %v1371_v18 }
 0x38d   : > { %v2097_v19 = vpop.eup %2096 }
 0x38e   : > { %v1374_v21 = vmul.f32 %v2097_v19, %v1360_v7 }
 0x390   : > { %v1383_v23 = vmul.f32 %v1650_v20, %v1374_v21 }
 0x391   : > { %v2099_v24 = vpop.eup %2098 }
 0x392   : > { %v1375_v25 = vmul.f32 %v2099_v24, %v1361_v10  ;;  %v1392_v26 = vadd.f32 %v1651_v22, %v1383_v23 }
 0x394   : > { %v1384_v27 = vmul.f32 %v1650_v20, %v1375_v25  ;;  %1394 = vst [vmem:[%s2824_s12] sm:$0xff] %v1392_v26 }
 0x396   : > { %v1393_v28 = vadd.f32 %v1651_v22, %v1384_v27 }
 0x398   : > { %1395 = vst [vmem:[%s2824_s12 + $0x8] sm:$0xff] %v1393_v28 }
 0x399   : > { %2231 = shalt.err (!%p2228_p4)
}
 0x39a   : > { %s2232_s12 = scalar_lea.hbm %s2942_s16, 256  ;;  %s2236_s21 = scalar_lea.hbm %s3117_s4, 1024 }
 0x39b   : > { %p2233_p10 = scmp.ne.s32.totalorder %s2942_s16, %s2232_s12  ;;  %p2237_p0 = scmp.lt.u32.totalorder %s2942_s16, %s3117_s4 }
 0x39c   : > { %p2238_p3 = scmp.lt.u32.totalorder %s2236_s21, %s2232_s12  ;;  %p2240_p11 = scmp.lt.u32.totalorder %s2232_s12, %s2942_s16 }
 0x39d   : > { %p2234_p9 = pnand %p2233_p10, %p3118_p12 }
 0x39e   : > { %p2239_p7 = por %p2238_p3, %p2237_p0 }
 0x39f   : > { %p2235_p8 = pneg %p2234_p9 }
 0x3a0   : > { %p2241_p13 = por %p2240_p11, %p2239_p7 }
 0x3a2   : > { %p2242_p5 = pnand %p2241_p13, %p2235_p8 }
 0x3a4   : > { %2245 = shalt.err (!%p2242_p5)
}
 0x3a5   : > { %s2391_s23 = smov 128   ;;  %s2392_s30 = smov 8  }
 0x3a6   : > { %1895 = dma.vmem_to_hbm [thread:$0]  (%p3118_p12), %s2944_s22, 256, %s2942_s16, %s1397_s5, %s2391_s23, %s2391_s23, %s2392_s30  }
 0x3a7 PF: > { %s3119_s2 = sld [smem:[#allocation17_spill]]  ;;  %s3120_s6 = sld [smem:[#allocation22_spill]] }
 0x3a8   : > { %p1918_p6 = scmp.ge.s32.totalorder %s2380_s14, 2 }
 0x3ad   : > { %s1427_s7 = sand.u32 1, %s3119_s2   ;;  %p3121_p2 = scmp.ne.s32.totalorder %s3120_s6, 0 }
 0x3ae   : > { %s1428_s11 = scalar_lea.sflag [#allocation5], %s1427_s7 }
 0x3af   : > { %p1912_p1 = pnand %p1918_p6, %p3121_p2 }
 0x3b1   : > { %2319 = dma.done.wait (!%p1912_p1), %s1428_s11, 256  }
 0x3b2   : > { %2321 = vsyncadd (!%p1912_p1), %s1428_s11, 4294967040  ;;  %s27_s14 = sadd.s32 1, %s2380_s14   ;;  %s3123_s10 = sld [smem:[#allocation20_spill]] }
 0x3b3   : > { %p2976_p4 = scmp.ge.s32.totalorder %s27_s14, 6   ;;  %s3124_s22 = sld [smem:[#allocation21_spill]] }
 0x3b4   : > { %s3125_s16 = sld [smem:[#allocation25_spill]]  ;;  %s3127_s24 = smov %s2332_s25 }
 0x3b5   : > { %s3128_s25 = smov %s2336_s26  ;;  %s3129_s26 = smov %s2749_s18 }
 0x3b6   : > { %s3130_s27 = smov %s2344_s28  ;;  %s3131_s28 = smov %s2348_s29 }
 0x3b7   : > { %s3132_s29 = smov %s2681_s3  ;;  %s3133_s30 = smov %s2356_s8 }
 0x3b8   : > { %s3134_s8 = smov %s2360_s9  ;;  %s3135_s9 = smov %s2676_s15 }
 0x3b9   : > { %s3136_s11 = smov %s2376_s13  ;;  %s3137_s12 = smov %s3124_s22 }
 0x3ba   : > { %s3138_s13 = smov %s3125_s16  ;;  %26 = sbr.rel (!%p2976_p4) target bundleno = 21 (0x15), region = 143 }
 0x3c1   :  { %1433 = vsyncpa [#allocation4], 1 }
 0x3c2   :  { %1435 = vsyncpa [#allocation4 + $0x1], 1 }
 0x3c3   :  { %1436 = vsyncpa [#allocation7], 1 }
 0x3c4   :  { %1438 = vsyncpa [#allocation7 + $0x1], 1 }
 0x3c5   :  { %1439 = vsyncpa [#allocation10], 1 }
 0x3c6   :  { %1440 = vsyncpa [#allocation5], 1 }
 0x3c7   :  { %1442 = vsyncpa [#allocation5 + $0x1], 1 }

</bundles_post_ra>
